<compile_context>
chip_gen: v6e
topology: v6e:2x2x1
jax: 0.10.0
libtpu: 0.0.40
codegen_flags: <defaults>
</compile_context>

<pallas_src>
import functools

import jax
import jax.numpy as jnp
from jax.experimental import pallas as pl
from jax.experimental.pallas import tpu as pltpu


# ---------------------------------------------------------------------------
# Fused kernel: both conv blocks + gamma gate + residuals in one invocation.
#
# In-kernel activation layout: (2C, N*H*W)
#   rows  0..C-1   : stream-1 channels   (sublane axis, all 8 rows used)
#   rows  C..2C-1  : stream-2 channels
#   lanes [batch0 pixels | batch1 pixels] (lane axis, N*H*W = 512 lanes)
# ---------------------------------------------------------------------------
def _fused_resblock_kernel(x_ref, w_ref, gb_ref, bnw_ref, bnb_ref, m_ref,
                           o1_ref, o2_ref, *, n, c, h, w, eps):
    hw = h * w
    nhw = n * hw
    # tap order k = ky*3 + kx  (matches the weight packing in the wrapper)
    offsets = [dy * w + dx for dy in (-1, 0, 1) for dx in (-1, 0, 1)]
    masks = [m_ref[k] for k in range(9)]            # each (1, nhw), hoisted

    def shift_lanes(v, off):
        # out[:, j] = v[:, (j + off) mod nhw]; out-of-image / cross-batch
        # wraparound taps are zeroed by the precomputed masks.
        s = off % nhw
        if s == 0:
            return v
        return jnp.concatenate([v[:, s:], v[:, :s]], axis=-1)

    def conv3x3_pair(z, widx, bias=None):
        # z: (2c, nhw).  One (2c, 18c) @ (18c, nhw) MXU matmul; the packed
        # block-diagonal weights evaluate both streams' 3x3 convs at once.
        taps = [shift_lanes(z, offsets[k]) * masks[k] for k in range(9)]
        patch = jnp.concatenate(taps, axis=0)        # (18c, nhw), 8-row pieces
        y = jnp.dot(w_ref[widx], patch, preferred_element_type=jnp.float32)
        if bias is not None:
            y = y + bias                             # (2c, 1) broadcast
        return y

    def bn_relu_pair(y, sidx):
        # Training-mode BatchNorm2d for both streams at once: per-row stats
        # over the lane axis == per-channel stats over (N, H, W); biased var.
        mean = jnp.mean(y, axis=1, keepdims=True)                   # (2c, 1)
        var = jnp.mean(jnp.square(y - mean), axis=1, keepdims=True)
        scale = bnw_ref[sidx] * jax.lax.rsqrt(var + eps)            # (2c, 1)
        shift = bnb_ref[sidx] - mean * scale
        return jnp.maximum(y * scale + shift, 0.0)

    # (n, 2c, hw) -> (2c, n*hw): batch gathered onto the lane axis.
    z0 = jnp.concatenate([x_ref[b] for b in range(n)], axis=-1)

    z = bn_relu_pair(conv3x3_pair(z0, 0), 0)   # conv1 + BN + ReLU, both streams
    z = bn_relu_pair(conv3x3_pair(z, 1), 1)    # conv2 + BN + ReLU, both streams

    # Gamma gate: rows 0..c-1 of the packed gamma conv read the stream-2 rows.
    gamma = jax.nn.sigmoid(conv3x3_pair(z, 2, bias=gb_ref[...])[:c])  # (c, nhw)

    out1 = z0[:c] + z[:c] * gamma              # x1 + x1_out * gamma
    out2 = z0[c:] + z[c:]                      # x2 + x2_out

    # Scatter back to (n, c, hw); 256-lane aligned, lane-dense stores.
    for b in range(n):
        o1_ref[b] = out1[:, b * hw:(b + 1) * hw]
        o2_ref[b] = out2[:, b * hw:(b + 1) * hw]


# ---------------------------------------------------------------------------
# Wrapper-side (tiny, constant-shaped) packing helpers.
# ---------------------------------------------------------------------------
def _fold_tap_major(w_oihw):
    # OIHW (c, c, 3, 3) -> (9, c, c) with tap index k = ky*3 + kx.
    c = w_oihw.shape[0]
    return jnp.transpose(w_oihw, (2, 3, 0, 1)).reshape(9, c, c)


def _pack_stream_weights(w_s1, w_s2):
    # Per-tap block-diagonal [[w_s1_k, 0], [0, w_s2_k]] concatenated along K
    # -> (2c, 9*2c): one matmul applies stream-1 weights to rows 0..c-1 and
    # stream-2 weights to rows c..2c-1 of the channel-packed activations.
    c = w_s1.shape[0]
    a, b = _fold_tap_major(w_s1), _fold_tap_major(w_s2)
    z = jnp.zeros((c, c), jnp.float32)
    return jnp.concatenate(
        [jnp.block([[a[k], z], [z, b[k]]]) for k in range(9)], axis=1)


def _pack_gamma_weights(w_g):
    # The gamma conv reads the stream-2 rows and writes rows 0..c-1 (its rows
    # c..2c-1 are unused zeros): per-tap block [[0, w_g_k], [0, 0]].
    c = w_g.shape[0]
    g = _fold_tap_major(w_g)
    z = jnp.zeros((c, c), jnp.float32)
    return jnp.concatenate(
        [jnp.block([[z, g[k]], [z, z]]) for k in range(9)], axis=1)


def _make_tap_masks(n, h, w):
    # masks[k, 0, :] = 1 where tap k's source pixel lies inside the image;
    # identical per batch element, tiled along the (batch-major) lane axis.
    yy = jnp.arange(h).reshape(h, 1)
    xx = jnp.arange(w).reshape(1, w)
    ms = []
    for dy in (-1, 0, 1):
        for dx in (-1, 0, 1):
            valid = ((yy + dy >= 0) & (yy + dy < h) &
                     (xx + dx >= 0) & (xx + dx < w))
            ms.append(valid.reshape(1, h * w))
    m = jnp.stack(ms, axis=0).astype(jnp.float32)        # (9, 1, h*w)
    return jnp.tile(m, (1, 1, n))                        # (9, 1, n*h*w)


def res_block_12(x1_nchw, x2_nchw, p):
    """Forward pass equivalent to PyTorch ResBlock_12.forward(x1, x2)."""
    n, c, h, w = x1_nchw.shape
    hw = h * w

    # Channel-pack the two streams (free reshapes + one tiny concat; no
    # transposes, no padding).
    x12 = jnp.concatenate(
        [x1_nchw.reshape(n, c, hw), x2_nchw.reshape(n, c, hw)],
        axis=1).astype(jnp.float32)                      # (n, 2c, hw)

    w_all = jnp.stack([                                   # (3, 2c, 18c)
        _pack_stream_weights(p["s1_w1"], p["s2_w1"]),
        _pack_stream_weights(p["s1_w2"], p["s2_w2"]),
        _pack_gamma_weights(p["g_w"]),
    ])
    g_b = jnp.concatenate([p["g_b"], jnp.zeros((c,), jnp.float32)]
                          ).reshape(2 * c, 1)
    bn_w = jnp.stack([jnp.concatenate([p["bn1a_w"], p["bn2a_w"]]),
                      jnp.concatenate([p["bn1b_w"], p["bn2b_w"]])]
                     ).reshape(2, 2 * c, 1)
    bn_b = jnp.stack([jnp.concatenate([p["bn1a_b"], p["bn2a_b"]]),
                      jnp.concatenate([p["bn1b_b"], p["bn2b_b"]])]
                     ).reshape(2, 2 * c, 1)
    masks = _make_tap_masks(n, h, w)

    kern = functools.partial(_fused_resblock_kernel,
                             n=n, c=c, h=h, w=w, eps=1e-5)
    vmem = pl.BlockSpec(memory_space=pltpu.MemorySpace.VMEM)
    o1, o2 = pl.pallas_call(
        kern,
        out_shape=(jax.ShapeDtypeStruct((n, c, hw), jnp.float32),
                   jax.ShapeDtypeStruct((n, c, hw), jnp.float32)),
        in_specs=[vmem] * 6,
        out_specs=(vmem, vmem),
    )(x12, w_all, g_b, bn_w, bn_b, masks)
    return o1.reshape(n, c, h, w), o2.reshape(n, c, h, w)


# ---------------------------------------------------------------------------
# Deterministic parameters (PyTorch-default-style init; per-layer BN params).
# ---------------------------------------------------------------------------
def init_params(key, c):
    ks = jax.random.split(key, 6)
    bound = 1.0 / float(c * 9) ** 0.5

    def conv_w(k):  # OIHW, as in torch.nn.Conv2d
        return jax.random.uniform(k, (c, c, 3, 3), jnp.float32, -bound, bound)

    ones = jnp.ones((c,), jnp.float32)
    zeros = jnp.zeros((c,), jnp.float32)
    return dict(
        s1_w1=conv_w(ks[0]), s1_w2=conv_w(ks[1]),     # stream-1 conv block
        s2_w1=conv_w(ks[2]), s2_w2=conv_w(ks[3]),     # stream-2 conv block
        g_w=conv_w(ks[4]),                            # gamma conv (has bias)
        g_b=jax.random.uniform(ks[5], (c,), jnp.float32, -bound, bound),
        bn1a_w=ones, bn1a_b=zeros, bn1b_w=ones, bn1b_b=zeros,
        bn2a_w=ones, bn2a_b=zeros, bn2b_w=ones, bn2b_b=zeros,
    )


def _reference(x1, x2, p, eps=1e-5):
    # Pure-XLA reference of the PyTorch forward (training-mode BN, biased var).
    def conv(x, w, b=None):
        y = jax.lax.conv_general_dilated(
            x, w, window_strides=(1, 1), padding=((1, 1), (1, 1)),
            dimension_numbers=("NCHW", "OIHW", "NCHW"),
            precision=jax.lax.Precision.HIGHEST)
        return y if b is None else y + b.reshape(1, -1, 1, 1)

    def bn_relu(y, g, b):
        mean = jnp.mean(y, axis=(0, 2, 3), keepdims=True)
        var = jnp.mean(jnp.square(y - mean), axis=(0, 2, 3), keepdims=True)
        yhat = (y - mean) / jnp.sqrt(var + eps)
        return jnp.maximum(yhat * g.reshape(1, -1, 1, 1)
                           + b.reshape(1, -1, 1, 1), 0.0)

    y1 = bn_relu(conv(x1, p["s1_w1"]), p["bn1a_w"], p["bn1a_b"])
    y1 = bn_relu(conv(y1, p["s1_w2"]), p["bn1b_w"], p["bn1b_b"])
    y2 = bn_relu(conv(x2, p["s2_w1"]), p["bn2a_w"], p["bn2a_b"])
    y2 = bn_relu(conv(y2, p["s2_w2"]), p["bn2b_w"], p["bn2b_b"])
    gamma = jax.nn.sigmoid(conv(y2, p["g_w"], p["g_b"]))
    return x1 + y1 * gamma, x2 + y2


if __name__ == "__main__":
    N, C, H, W = 2, 4, 16, 16
    key = jax.random.PRNGKey(0)
    k1, k2, kp = jax.random.split(key, 3)

    x1 = jax.random.normal(k1, (N, C, H, W), jnp.float32)
    x2 = jax.random.normal(k2, (N, C, H, W), jnp.float32)
    params = init_params(kp, C)

    fwd = jax.jit(res_block_12)
    o1, o2 = fwd(x1, x2, params)
    jax.block_until_ready((o1, o2))
    assert o1.shape == (N, C, H, W) and o2.shape == (N, C, H, W)

    # Numerical check against the pure-XLA reference of the PyTorch forward.
    r1, r2 = _reference(x1, x2, params)
    assert jnp.allclose(o1, r1, atol=5e-3, rtol=5e-3), \
        float(jnp.max(jnp.abs(o1 - r1)))
    assert jnp.allclose(o2, r2, atol=5e-3, rtol=5e-3), \
        float(jnp.max(jnp.abs(o2 - r2)))
    print("KERNEL_OK")
</pallas_src>

<mosaic_0001>
module attributes {stable_mosaic.version = 11 : i64} {
  func.func @_fused_resblock_kernel(%arg0: memref<2x8x256xf32, #tpu.memory_space<vmem>>, %arg1: memref<3x8x72xf32, #tpu.memory_space<vmem>>, %arg2: memref<8x1xf32, #tpu.memory_space<vmem>>, %arg3: memref<2x8x1xf32, #tpu.memory_space<vmem>>, %arg4: memref<2x8x1xf32, #tpu.memory_space<vmem>>, %arg5: memref<9x1x512xf32, #tpu.memory_space<vmem>>, %arg6: memref<2x4x256xf32, #tpu.memory_space<vmem>>, %arg7: memref<2x4x256xf32, #tpu.memory_space<vmem>>) attributes {dimension_semantics = [], scalar_prefetch = 0 : i64, scratch_operands = 0 : i64, tpu.core_type = #tpu.core_type<tc>} {
    %c0 = arith.constant 0 : index
    %c0_0 = arith.constant 0 : index
    %c0_1 = arith.constant 0 : index
    %0 = vector.load %arg5[%c0, %c0_0, %c0_1] : memref<9x1x512xf32, #tpu.memory_space<vmem>>, vector<1x1x512xf32>
    %1 = vector.shape_cast %0 : vector<1x1x512xf32> to vector<1x512xf32>
    %c1 = arith.constant 1 : index
    %c0_2 = arith.constant 0 : index
    %c0_3 = arith.constant 0 : index
    %2 = vector.load %arg5[%c1, %c0_2, %c0_3] : memref<9x1x512xf32, #tpu.memory_space<vmem>>, vector<1x1x512xf32>
    %3 = vector.shape_cast %2 : vector<1x1x512xf32> to vector<1x512xf32>
    %c2 = arith.constant 2 : index
    %c0_4 = arith.constant 0 : index
    %c0_5 = arith.constant 0 : index
    %4 = vector.load %arg5[%c2, %c0_4, %c0_5] : memref<9x1x512xf32, #tpu.memory_space<vmem>>, vector<1x1x512xf32>
    %5 = vector.shape_cast %4 : vector<1x1x512xf32> to vector<1x512xf32>
    %c3 = arith.constant 3 : index
    %c0_6 = arith.constant 0 : index
    %c0_7 = arith.constant 0 : index
    %6 = vector.load %arg5[%c3, %c0_6, %c0_7] : memref<9x1x512xf32, #tpu.memory_space<vmem>>, vector<1x1x512xf32>
    %7 = vector.shape_cast %6 : vector<1x1x512xf32> to vector<1x512xf32>
    %c4 = arith.constant 4 : index
    %c0_8 = arith.constant 0 : index
    %c0_9 = arith.constant 0 : index
    %8 = vector.load %arg5[%c4, %c0_8, %c0_9] : memref<9x1x512xf32, #tpu.memory_space<vmem>>, vector<1x1x512xf32>
    %9 = vector.shape_cast %8 : vector<1x1x512xf32> to vector<1x512xf32>
    %c5 = arith.constant 5 : index
    %c0_10 = arith.constant 0 : index
    %c0_11 = arith.constant 0 : index
    %10 = vector.load %arg5[%c5, %c0_10, %c0_11] : memref<9x1x512xf32, #tpu.memory_space<vmem>>, vector<1x1x512xf32>
    %11 = vector.shape_cast %10 : vector<1x1x512xf32> to vector<1x512xf32>
    %c6 = arith.constant 6 : index
    %c0_12 = arith.constant 0 : index
    %c0_13 = arith.constant 0 : index
    %12 = vector.load %arg5[%c6, %c0_12, %c0_13] : memref<9x1x512xf32, #tpu.memory_space<vmem>>, vector<1x1x512xf32>
    %13 = vector.shape_cast %12 : vector<1x1x512xf32> to vector<1x512xf32>
    %c7 = arith.constant 7 : index
    %c0_14 = arith.constant 0 : index
    %c0_15 = arith.constant 0 : index
    %14 = vector.load %arg5[%c7, %c0_14, %c0_15] : memref<9x1x512xf32, #tpu.memory_space<vmem>>, vector<1x1x512xf32>
    %15 = vector.shape_cast %14 : vector<1x1x512xf32> to vector<1x512xf32>
    %c8 = arith.constant 8 : index
    %c0_16 = arith.constant 0 : index
    %c0_17 = arith.constant 0 : index
    %16 = vector.load %arg5[%c8, %c0_16, %c0_17] : memref<9x1x512xf32, #tpu.memory_space<vmem>>, vector<1x1x512xf32>
    %17 = vector.shape_cast %16 : vector<1x1x512xf32> to vector<1x512xf32>
    %c0_18 = arith.constant 0 : index
    %c0_19 = arith.constant 0 : index
    %c0_20 = arith.constant 0 : index
    %18 = vector.load %arg0[%c0_18, %c0_19, %c0_20] : memref<2x8x256xf32, #tpu.memory_space<vmem>>, vector<1x8x256xf32>
    %19 = vector.shape_cast %18 : vector<1x8x256xf32> to vector<8x256xf32>
    %c1_21 = arith.constant 1 : index
    %c0_22 = arith.constant 0 : index
    %c0_23 = arith.constant 0 : index
    %20 = vector.load %arg0[%c1_21, %c0_22, %c0_23] : memref<2x8x256xf32, #tpu.memory_space<vmem>>, vector<1x8x256xf32>
    %21 = vector.shape_cast %20 : vector<1x8x256xf32> to vector<8x256xf32>
    %22 = tpu.concatenate %19, %21 in 1 : vector<8x256xf32>, vector<8x256xf32> -> vector<8x512xf32>
    %23 = vector.extract_strided_slice %22 {offsets = [0, 495], sizes = [8, 17], strides = [1, 1]} : vector<8x512xf32> to vector<8x17xf32>
    %24 = vector.extract_strided_slice %22 {offsets = [0, 0], sizes = [8, 495], strides = [1, 1]} : vector<8x512xf32> to vector<8x495xf32>
    %25 = tpu.concatenate %23, %24 in 1 : vector<8x17xf32>, vector<8x495xf32> -> vector<8x512xf32>
    %26 = vector.broadcast %1 : vector<1x512xf32> to vector<8x512xf32>
    %27 = arith.mulf %25, %26 : vector<8x512xf32>
    %28 = vector.extract_strided_slice %22 {offsets = [0, 496], sizes = [8, 16], strides = [1, 1]} : vector<8x512xf32> to vector<8x16xf32>
    %29 = vector.extract_strided_slice %22 {offsets = [0, 0], sizes = [8, 496], strides = [1, 1]} : vector<8x512xf32> to vector<8x496xf32>
    %30 = tpu.concatenate %28, %29 in 1 : vector<8x16xf32>, vector<8x496xf32> -> vector<8x512xf32>
    %31 = vector.broadcast %3 : vector<1x512xf32> to vector<8x512xf32>
    %32 = arith.mulf %30, %31 : vector<8x512xf32>
    %33 = vector.extract_strided_slice %22 {offsets = [0, 497], sizes = [8, 15], strides = [1, 1]} : vector<8x512xf32> to vector<8x15xf32>
    %34 = vector.extract_strided_slice %22 {offsets = [0, 0], sizes = [8, 497], strides = [1, 1]} : vector<8x512xf32> to vector<8x497xf32>
    %35 = tpu.concatenate %33, %34 in 1 : vector<8x15xf32>, vector<8x497xf32> -> vector<8x512xf32>
    %36 = vector.broadcast %5 : vector<1x512xf32> to vector<8x512xf32>
    %37 = arith.mulf %35, %36 : vector<8x512xf32>
    %38 = vector.extract_strided_slice %22 {offsets = [0, 511], sizes = [8, 1], strides = [1, 1]} : vector<8x512xf32> to vector<8x1xf32>
    %39 = vector.extract_strided_slice %22 {offsets = [0, 0], sizes = [8, 511], strides = [1, 1]} : vector<8x512xf32> to vector<8x511xf32>
    %40 = tpu.concatenate %38, %39 in 1 : vector<8x1xf32>, vector<8x511xf32> -> vector<8x512xf32>
    %41 = vector.broadcast %7 : vector<1x512xf32> to vector<8x512xf32>
    %42 = arith.mulf %40, %41 : vector<8x512xf32>
    %43 = vector.broadcast %9 : vector<1x512xf32> to vector<8x512xf32>
    %44 = arith.mulf %22, %43 : vector<8x512xf32>
    %45 = vector.extract_strided_slice %22 {offsets = [0, 1], sizes = [8, 511], strides = [1, 1]} : vector<8x512xf32> to vector<8x511xf32>
    %46 = vector.extract_strided_slice %22 {offsets = [0, 0], sizes = [8, 1], strides = [1, 1]} : vector<8x512xf32> to vector<8x1xf32>
    %47 = tpu.concatenate %45, %46 in 1 : vector<8x511xf32>, vector<8x1xf32> -> vector<8x512xf32>
    %48 = vector.broadcast %11 : vector<1x512xf32> to vector<8x512xf32>
    %49 = arith.mulf %47, %48 : vector<8x512xf32>
    %50 = vector.extract_strided_slice %22 {offsets = [0, 15], sizes = [8, 497], strides = [1, 1]} : vector<8x512xf32> to vector<8x497xf32>
    %51 = vector.extract_strided_slice %22 {offsets = [0, 0], sizes = [8, 15], strides = [1, 1]} : vector<8x512xf32> to vector<8x15xf32>
    %52 = tpu.concatenate %50, %51 in 1 : vector<8x497xf32>, vector<8x15xf32> -> vector<8x512xf32>
    %53 = vector.broadcast %13 : vector<1x512xf32> to vector<8x512xf32>
    %54 = arith.mulf %52, %53 : vector<8x512xf32>
    %55 = vector.extract_strided_slice %22 {offsets = [0, 16], sizes = [8, 496], strides = [1, 1]} : vector<8x512xf32> to vector<8x496xf32>
    %56 = vector.extract_strided_slice %22 {offsets = [0, 0], sizes = [8, 16], strides = [1, 1]} : vector<8x512xf32> to vector<8x16xf32>
    %57 = tpu.concatenate %55, %56 in 1 : vector<8x496xf32>, vector<8x16xf32> -> vector<8x512xf32>
    %58 = vector.broadcast %15 : vector<1x512xf32> to vector<8x512xf32>
    %59 = arith.mulf %57, %58 : vector<8x512xf32>
    %60 = vector.extract_strided_slice %22 {offsets = [0, 17], sizes = [8, 495], strides = [1, 1]} : vector<8x512xf32> to vector<8x495xf32>
    %61 = vector.extract_strided_slice %22 {offsets = [0, 0], sizes = [8, 17], strides = [1, 1]} : vector<8x512xf32> to vector<8x17xf32>
    %62 = tpu.concatenate %60, %61 in 1 : vector<8x495xf32>, vector<8x17xf32> -> vector<8x512xf32>
    %63 = vector.broadcast %17 : vector<1x512xf32> to vector<8x512xf32>
    %64 = arith.mulf %62, %63 : vector<8x512xf32>
    %65 = tpu.concatenate %27, %32, %37, %42, %44, %49, %54, %59, %64 in 0 : vector<8x512xf32>, vector<8x512xf32>, vector<8x512xf32>, vector<8x512xf32>, vector<8x512xf32>, vector<8x512xf32>, vector<8x512xf32>, vector<8x512xf32>, vector<8x512xf32> -> vector<72x512xf32>
    %c0_24 = arith.constant 0 : index
    %c0_25 = arith.constant 0 : index
    %c0_26 = arith.constant 0 : index
    %66 = vector.load %arg1[%c0_24, %c0_25, %c0_26] : memref<3x8x72xf32, #tpu.memory_space<vmem>>, vector<1x8x72xf32>
    %67 = vector.shape_cast %66 : vector<1x8x72xf32> to vector<8x72xf32>
    %cst = arith.constant dense<0.000000e+00> : vector<8x512xf32>
    %68 = tpu.matmul %67, %65, %cst {dimension_numbers = #tpu.dot_dimension_numbers<[1], [0], [0], [1], [0, 0, 1, 1], [], []>} : vector<8x72xf32>, vector<72x512xf32>, vector<8x512xf32> -> vector<8x512xf32>
    %cst_27 = arith.constant dense<0.000000e+00> : vector<8xf32>
    %69 = vector.multi_reduction <add>, %68, %cst_27 [1] : vector<8x512xf32> to vector<8xf32>
    %70 = vector.shape_cast %69 : vector<8xf32> to vector<8x1xf32>
    %cst_28 = arith.constant 5.120000e+02 : f32
    %71 = vector.broadcast %cst_28 : f32 to vector<8x1xf32>
    %72 = arith.divf %70, %71 : vector<8x1xf32>
    %73 = vector.broadcast %72 : vector<8x1xf32> to vector<8x512xf32>
    %74 = arith.subf %68, %73 : vector<8x512xf32>
    %75 = arith.mulf %74, %74 : vector<8x512xf32>
    %cst_29 = arith.constant dense<0.000000e+00> : vector<8xf32>
    %76 = vector.multi_reduction <add>, %75, %cst_29 [1] : vector<8x512xf32> to vector<8xf32>
    %77 = vector.shape_cast %76 : vector<8xf32> to vector<8x1xf32>
    %cst_30 = arith.constant 5.120000e+02 : f32
    %78 = vector.broadcast %cst_30 : f32 to vector<8x1xf32>
    %79 = arith.divf %77, %78 : vector<8x1xf32>
    %c0_31 = arith.constant 0 : index
    %c0_32 = arith.constant 0 : index
    %c0_33 = arith.constant 0 : index
    %80 = vector.load %arg3[%c0_31, %c0_32, %c0_33] : memref<2x8x1xf32, #tpu.memory_space<vmem>>, vector<1x8x1xf32>
    %81 = vector.shape_cast %80 : vector<1x8x1xf32> to vector<8x1xf32>
    %cst_34 = arith.constant 9.99999974E-6 : f32
    %82 = vector.broadcast %cst_34 : f32 to vector<8x1xf32>
    %83 = arith.addf %79, %82 : vector<8x1xf32>
    %84 = math.rsqrt %83 : vector<8x1xf32>
    %85 = arith.mulf %81, %84 : vector<8x1xf32>
    %c0_35 = arith.constant 0 : index
    %c0_36 = arith.constant 0 : index
    %c0_37 = arith.constant 0 : index
    %86 = vector.load %arg4[%c0_35, %c0_36, %c0_37] : memref<2x8x1xf32, #tpu.memory_space<vmem>>, vector<1x8x1xf32>
    %87 = vector.shape_cast %86 : vector<1x8x1xf32> to vector<8x1xf32>
    %88 = arith.mulf %72, %85 : vector<8x1xf32>
    %89 = arith.subf %87, %88 : vector<8x1xf32>
    %90 = vector.broadcast %85 : vector<8x1xf32> to vector<8x512xf32>
    %91 = arith.mulf %68, %90 : vector<8x512xf32>
    %92 = vector.broadcast %89 : vector<8x1xf32> to vector<8x512xf32>
    %93 = arith.addf %91, %92 : vector<8x512xf32>
    %cst_38 = arith.constant 0.000000e+00 : f32
    %94 = vector.broadcast %cst_38 : f32 to vector<8x512xf32>
    %95 = arith.maximumf %93, %94 : vector<8x512xf32>
    %96 = vector.extract_strided_slice %95 {offsets = [0, 495], sizes = [8, 17], strides = [1, 1]} : vector<8x512xf32> to vector<8x17xf32>
    %97 = vector.extract_strided_slice %95 {offsets = [0, 0], sizes = [8, 495], strides = [1, 1]} : vector<8x512xf32> to vector<8x495xf32>
    %98 = tpu.concatenate %96, %97 in 1 : vector<8x17xf32>, vector<8x495xf32> -> vector<8x512xf32>
    %99 = vector.broadcast %1 : vector<1x512xf32> to vector<8x512xf32>
    %100 = arith.mulf %98, %99 : vector<8x512xf32>
    %101 = vector.extract_strided_slice %95 {offsets = [0, 496], sizes = [8, 16], strides = [1, 1]} : vector<8x512xf32> to vector<8x16xf32>
    %102 = vector.extract_strided_slice %95 {offsets = [0, 0], sizes = [8, 496], strides = [1, 1]} : vector<8x512xf32> to vector<8x496xf32>
    %103 = tpu.concatenate %101, %102 in 1 : vector<8x16xf32>, vector<8x496xf32> -> vector<8x512xf32>
    %104 = vector.broadcast %3 : vector<1x512xf32> to vector<8x512xf32>
    %105 = arith.mulf %103, %104 : vector<8x512xf32>
    %106 = vector.extract_strided_slice %95 {offsets = [0, 497], sizes = [8, 15], strides = [1, 1]} : vector<8x512xf32> to vector<8x15xf32>
    %107 = vector.extract_strided_slice %95 {offsets = [0, 0], sizes = [8, 497], strides = [1, 1]} : vector<8x512xf32> to vector<8x497xf32>
    %108 = tpu.concatenate %106, %107 in 1 : vector<8x15xf32>, vector<8x497xf32> -> vector<8x512xf32>
    %109 = vector.broadcast %5 : vector<1x512xf32> to vector<8x512xf32>
    %110 = arith.mulf %108, %109 : vector<8x512xf32>
    %111 = vector.extract_strided_slice %95 {offsets = [0, 511], sizes = [8, 1], strides = [1, 1]} : vector<8x512xf32> to vector<8x1xf32>
    %112 = vector.extract_strided_slice %95 {offsets = [0, 0], sizes = [8, 511], strides = [1, 1]} : vector<8x512xf32> to vector<8x511xf32>
    %113 = tpu.concatenate %111, %112 in 1 : vector<8x1xf32>, vector<8x511xf32> -> vector<8x512xf32>
    %114 = vector.broadcast %7 : vector<1x512xf32> to vector<8x512xf32>
    %115 = arith.mulf %113, %114 : vector<8x512xf32>
    %116 = vector.broadcast %9 : vector<1x512xf32> to vector<8x512xf32>
    %117 = arith.mulf %95, %116 : vector<8x512xf32>
    %118 = vector.extract_strided_slice %95 {offsets = [0, 1], sizes = [8, 511], strides = [1, 1]} : vector<8x512xf32> to vector<8x511xf32>
    %119 = vector.extract_strided_slice %95 {offsets = [0, 0], sizes = [8, 1], strides = [1, 1]} : vector<8x512xf32> to vector<8x1xf32>
    %120 = tpu.concatenate %118, %119 in 1 : vector<8x511xf32>, vector<8x1xf32> -> vector<8x512xf32>
    %121 = vector.broadcast %11 : vector<1x512xf32> to vector<8x512xf32>
    %122 = arith.mulf %120, %121 : vector<8x512xf32>
    %123 = vector.extract_strided_slice %95 {offsets = [0, 15], sizes = [8, 497], strides = [1, 1]} : vector<8x512xf32> to vector<8x497xf32>
    %124 = vector.extract_strided_slice %95 {offsets = [0, 0], sizes = [8, 15], strides = [1, 1]} : vector<8x512xf32> to vector<8x15xf32>
    %125 = tpu.concatenate %123, %124 in 1 : vector<8x497xf32>, vector<8x15xf32> -> vector<8x512xf32>
    %126 = vector.broadcast %13 : vector<1x512xf32> to vector<8x512xf32>
    %127 = arith.mulf %125, %126 : vector<8x512xf32>
    %128 = vector.extract_strided_slice %95 {offsets = [0, 16], sizes = [8, 496], strides = [1, 1]} : vector<8x512xf32> to vector<8x496xf32>
    %129 = vector.extract_strided_slice %95 {offsets = [0, 0], sizes = [8, 16], strides = [1, 1]} : vector<8x512xf32> to vector<8x16xf32>
    %130 = tpu.concatenate %128, %129 in 1 : vector<8x496xf32>, vector<8x16xf32> -> vector<8x512xf32>
    %131 = vector.broadcast %15 : vector<1x512xf32> to vector<8x512xf32>
    %132 = arith.mulf %130, %131 : vector<8x512xf32>
    %133 = vector.extract_strided_slice %95 {offsets = [0, 17], sizes = [8, 495], strides = [1, 1]} : vector<8x512xf32> to vector<8x495xf32>
    %134 = vector.extract_strided_slice %95 {offsets = [0, 0], sizes = [8, 17], strides = [1, 1]} : vector<8x512xf32> to vector<8x17xf32>
    %135 = tpu.concatenate %133, %134 in 1 : vector<8x495xf32>, vector<8x17xf32> -> vector<8x512xf32>
    %136 = vector.broadcast %17 : vector<1x512xf32> to vector<8x512xf32>
    %137 = arith.mulf %135, %136 : vector<8x512xf32>
    %138 = tpu.concatenate %100, %105, %110, %115, %117, %122, %127, %132, %137 in 0 : vector<8x512xf32>, vector<8x512xf32>, vector<8x512xf32>, vector<8x512xf32>, vector<8x512xf32>, vector<8x512xf32>, vector<8x512xf32>, vector<8x512xf32>, vector<8x512xf32> -> vector<72x512xf32>
    %c1_39 = arith.constant 1 : index
    %c0_40 = arith.constant 0 : index
    %c0_41 = arith.constant 0 : index
    %139 = vector.load %arg1[%c1_39, %c0_40, %c0_41] : memref<3x8x72xf32, #tpu.memory_space<vmem>>, vector<1x8x72xf32>
    %140 = vector.shape_cast %139 : vector<1x8x72xf32> to vector<8x72xf32>
    %cst_42 = arith.constant dense<0.000000e+00> : vector<8x512xf32>
    %141 = tpu.matmul %140, %138, %cst_42 {dimension_numbers = #tpu.dot_dimension_numbers<[1], [0], [0], [1], [0, 0, 1, 1], [], []>} : vector<8x72xf32>, vector<72x512xf32>, vector<8x512xf32> -> vector<8x512xf32>
    %cst_43 = arith.constant dense<0.000000e+00> : vector<8xf32>
    %142 = vector.multi_reduction <add>, %141, %cst_43 [1] : vector<8x512xf32> to vector<8xf32>
    %143 = vector.shape_cast %142 : vector<8xf32> to vector<8x1xf32>
    %cst_44 = arith.constant 5.120000e+02 : f32
    %144 = vector.broadcast %cst_44 : f32 to vector<8x1xf32>
    %145 = arith.divf %143, %144 : vector<8x1xf32>
    %146 = vector.broadcast %145 : vector<8x1xf32> to vector<8x512xf32>
    %147 = arith.subf %141, %146 : vector<8x512xf32>
    %148 = arith.mulf %147, %147 : vector<8x512xf32>
    %cst_45 = arith.constant dense<0.000000e+00> : vector<8xf32>
    %149 = vector.multi_reduction <add>, %148, %cst_45 [1] : vector<8x512xf32> to vector<8xf32>
    %150 = vector.shape_cast %149 : vector<8xf32> to vector<8x1xf32>
    %cst_46 = arith.constant 5.120000e+02 : f32
    %151 = vector.broadcast %cst_46 : f32 to vector<8x1xf32>
    %152 = arith.divf %150, %151 : vector<8x1xf32>
    %c1_47 = arith.constant 1 : index
    %c0_48 = arith.constant 0 : index
    %c0_49 = arith.constant 0 : index
    %153 = vector.load %arg3[%c1_47, %c0_48, %c0_49] : memref<2x8x1xf32, #tpu.memory_space<vmem>>, vector<1x8x1xf32>
    %154 = vector.shape_cast %153 : vector<1x8x1xf32> to vector<8x1xf32>
    %cst_50 = arith.constant 9.99999974E-6 : f32
    %155 = vector.broadcast %cst_50 : f32 to vector<8x1xf32>
    %156 = arith.addf %152, %155 : vector<8x1xf32>
    %157 = math.rsqrt %156 : vector<8x1xf32>
    %158 = arith.mulf %154, %157 : vector<8x1xf32>
    %c1_51 = arith.constant 1 : index
    %c0_52 = arith.constant 0 : index
    %c0_53 = arith.constant 0 : index
    %159 = vector.load %arg4[%c1_51, %c0_52, %c0_53] : memref<2x8x1xf32, #tpu.memory_space<vmem>>, vector<1x8x1xf32>
    %160 = vector.shape_cast %159 : vector<1x8x1xf32> to vector<8x1xf32>
    %161 = arith.mulf %145, %158 : vector<8x1xf32>
    %162 = arith.subf %160, %161 : vector<8x1xf32>
    %163 = vector.broadcast %158 : vector<8x1xf32> to vector<8x512xf32>
    %164 = arith.mulf %141, %163 : vector<8x512xf32>
    %165 = vector.broadcast %162 : vector<8x1xf32> to vector<8x512xf32>
    %166 = arith.addf %164, %165 : vector<8x512xf32>
    %cst_54 = arith.constant 0.000000e+00 : f32
    %167 = vector.broadcast %cst_54 : f32 to vector<8x512xf32>
    %168 = arith.maximumf %166, %167 : vector<8x512xf32>
    %c0_55 = arith.constant 0 : index
    %c0_56 = arith.constant 0 : index
    %169 = vector.load %arg2[%c0_55, %c0_56] : memref<8x1xf32, #tpu.memory_space<vmem>>, vector<8x1xf32>
    %170 = vector.extract_strided_slice %168 {offsets = [0, 495], sizes = [8, 17], strides = [1, 1]} : vector<8x512xf32> to vector<8x17xf32>
    %171 = vector.extract_strided_slice %168 {offsets = [0, 0], sizes = [8, 495], strides = [1, 1]} : vector<8x512xf32> to vector<8x495xf32>
    %172 = tpu.concatenate %170, %171 in 1 : vector<8x17xf32>, vector<8x495xf32> -> vector<8x512xf32>
    %173 = vector.broadcast %1 : vector<1x512xf32> to vector<8x512xf32>
    %174 = arith.mulf %172, %173 : vector<8x512xf32>
    %175 = vector.extract_strided_slice %168 {offsets = [0, 496], sizes = [8, 16], strides = [1, 1]} : vector<8x512xf32> to vector<8x16xf32>
    %176 = vector.extract_strided_slice %168 {offsets = [0, 0], sizes = [8, 496], strides = [1, 1]} : vector<8x512xf32> to vector<8x496xf32>
    %177 = tpu.concatenate %175, %176 in 1 : vector<8x16xf32>, vector<8x496xf32> -> vector<8x512xf32>
    %178 = vector.broadcast %3 : vector<1x512xf32> to vector<8x512xf32>
    %179 = arith.mulf %177, %178 : vector<8x512xf32>
    %180 = vector.extract_strided_slice %168 {offsets = [0, 497], sizes = [8, 15], strides = [1, 1]} : vector<8x512xf32> to vector<8x15xf32>
    %181 = vector.extract_strided_slice %168 {offsets = [0, 0], sizes = [8, 497], strides = [1, 1]} : vector<8x512xf32> to vector<8x497xf32>
    %182 = tpu.concatenate %180, %181 in 1 : vector<8x15xf32>, vector<8x497xf32> -> vector<8x512xf32>
    %183 = vector.broadcast %5 : vector<1x512xf32> to vector<8x512xf32>
    %184 = arith.mulf %182, %183 : vector<8x512xf32>
    %185 = vector.extract_strided_slice %168 {offsets = [0, 511], sizes = [8, 1], strides = [1, 1]} : vector<8x512xf32> to vector<8x1xf32>
    %186 = vector.extract_strided_slice %168 {offsets = [0, 0], sizes = [8, 511], strides = [1, 1]} : vector<8x512xf32> to vector<8x511xf32>
    %187 = tpu.concatenate %185, %186 in 1 : vector<8x1xf32>, vector<8x511xf32> -> vector<8x512xf32>
    %188 = vector.broadcast %7 : vector<1x512xf32> to vector<8x512xf32>
    %189 = arith.mulf %187, %188 : vector<8x512xf32>
    %190 = vector.broadcast %9 : vector<1x512xf32> to vector<8x512xf32>
    %191 = arith.mulf %168, %190 : vector<8x512xf32>
    %192 = vector.extract_strided_slice %168 {offsets = [0, 1], sizes = [8, 511], strides = [1, 1]} : vector<8x512xf32> to vector<8x511xf32>
    %193 = vector.extract_strided_slice %168 {offsets = [0, 0], sizes = [8, 1], strides = [1, 1]} : vector<8x512xf32> to vector<8x1xf32>
    %194 = tpu.concatenate %192, %193 in 1 : vector<8x511xf32>, vector<8x1xf32> -> vector<8x512xf32>
    %195 = vector.broadcast %11 : vector<1x512xf32> to vector<8x512xf32>
    %196 = arith.mulf %194, %195 : vector<8x512xf32>
    %197 = vector.extract_strided_slice %168 {offsets = [0, 15], sizes = [8, 497], strides = [1, 1]} : vector<8x512xf32> to vector<8x497xf32>
    %198 = vector.extract_strided_slice %168 {offsets = [0, 0], sizes = [8, 15], strides = [1, 1]} : vector<8x512xf32> to vector<8x15xf32>
    %199 = tpu.concatenate %197, %198 in 1 : vector<8x497xf32>, vector<8x15xf32> -> vector<8x512xf32>
    %200 = vector.broadcast %13 : vector<1x512xf32> to vector<8x512xf32>
    %201 = arith.mulf %199, %200 : vector<8x512xf32>
    %202 = vector.extract_strided_slice %168 {offsets = [0, 16], sizes = [8, 496], strides = [1, 1]} : vector<8x512xf32> to vector<8x496xf32>
    %203 = vector.extract_strided_slice %168 {offsets = [0, 0], sizes = [8, 16], strides = [1, 1]} : vector<8x512xf32> to vector<8x16xf32>
    %204 = tpu.concatenate %202, %203 in 1 : vector<8x496xf32>, vector<8x16xf32> -> vector<8x512xf32>
    %205 = vector.broadcast %15 : vector<1x512xf32> to vector<8x512xf32>
    %206 = arith.mulf %204, %205 : vector<8x512xf32>
    %207 = vector.extract_strided_slice %168 {offsets = [0, 17], sizes = [8, 495], strides = [1, 1]} : vector<8x512xf32> to vector<8x495xf32>
    %208 = vector.extract_strided_slice %168 {offsets = [0, 0], sizes = [8, 17], strides = [1, 1]} : vector<8x512xf32> to vector<8x17xf32>
    %209 = tpu.concatenate %207, %208 in 1 : vector<8x495xf32>, vector<8x17xf32> -> vector<8x512xf32>
    %210 = vector.broadcast %17 : vector<1x512xf32> to vector<8x512xf32>
    %211 = arith.mulf %209, %210 : vector<8x512xf32>
    %212 = tpu.concatenate %174, %179, %184, %189, %191, %196, %201, %206, %211 in 0 : vector<8x512xf32>, vector<8x512xf32>, vector<8x512xf32>, vector<8x512xf32>, vector<8x512xf32>, vector<8x512xf32>, vector<8x512xf32>, vector<8x512xf32>, vector<8x512xf32> -> vector<72x512xf32>
    %c2_57 = arith.constant 2 : index
    %c0_58 = arith.constant 0 : index
    %c0_59 = arith.constant 0 : index
    %213 = vector.load %arg1[%c2_57, %c0_58, %c0_59] : memref<3x8x72xf32, #tpu.memory_space<vmem>>, vector<1x8x72xf32>
    %214 = vector.shape_cast %213 : vector<1x8x72xf32> to vector<8x72xf32>
    %cst_60 = arith.constant dense<0.000000e+00> : vector<8x512xf32>
    %215 = tpu.matmul %214, %212, %cst_60 {dimension_numbers = #tpu.dot_dimension_numbers<[1], [0], [0], [1], [0, 0, 1, 1], [], []>} : vector<8x72xf32>, vector<72x512xf32>, vector<8x512xf32> -> vector<8x512xf32>
    %216 = vector.broadcast %169 : vector<8x1xf32> to vector<8x512xf32>
    %217 = arith.addf %215, %216 : vector<8x512xf32>
    %218 = vector.extract_strided_slice %217 {offsets = [0, 0], sizes = [4, 512], strides = [1, 1]} : vector<8x512xf32> to vector<4x512xf32>
    %219 = arith.negf %218 : vector<4x512xf32>
    %220 = math.exp %219 : vector<4x512xf32>
    %cst_61 = arith.constant 1.000000e+00 : f32
    %221 = vector.broadcast %cst_61 : f32 to vector<4x512xf32>
    %222 = arith.addf %221, %220 : vector<4x512xf32>
    %223 = arith.divf %221, %222 : vector<4x512xf32>
    %224 = vector.extract_strided_slice %22 {offsets = [0, 0], sizes = [4, 512], strides = [1, 1]} : vector<8x512xf32> to vector<4x512xf32>
    %225 = vector.extract_strided_slice %168 {offsets = [0, 0], sizes = [4, 512], strides = [1, 1]} : vector<8x512xf32> to vector<4x512xf32>
    %226 = arith.mulf %225, %223 : vector<4x512xf32>
    %227 = arith.addf %224, %226 : vector<4x512xf32>
    %228 = vector.extract_strided_slice %22 {offsets = [4, 0], sizes = [4, 512], strides = [1, 1]} : vector<8x512xf32> to vector<4x512xf32>
    %229 = vector.extract_strided_slice %168 {offsets = [4, 0], sizes = [4, 512], strides = [1, 1]} : vector<8x512xf32> to vector<4x512xf32>
    %230 = arith.addf %228, %229 : vector<4x512xf32>
    %231 = vector.extract_strided_slice %227 {offsets = [0, 0], sizes = [4, 256], strides = [1, 1]} : vector<4x512xf32> to vector<4x256xf32>
    %c0_62 = arith.constant 0 : index
    %c0_63 = arith.constant 0 : index
    %c0_64 = arith.constant 0 : index
    %232 = vector.load %arg6[%c0_62, %c0_63, %c0_64] : memref<2x4x256xf32, #tpu.memory_space<vmem>>, vector<1x4x256xf32>
    %233 = vector.shape_cast %232 : vector<1x4x256xf32> to vector<4x256xf32>
    %234 = vector.shape_cast %231 : vector<4x256xf32> to vector<1x4x256xf32>
    tpu.vector_store %arg6[%c0_62, %c0_63, %c0_64], %234 {strides = array<i32>} : memref<2x4x256xf32, #tpu.memory_space<vmem>>, vector<1x4x256xf32>,
    %235 = vector.extract_strided_slice %230 {offsets = [0, 0], sizes = [4, 256], strides = [1, 1]} : vector<4x512xf32> to vector<4x256xf32>
    %c0_65 = arith.constant 0 : index
    %c0_66 = arith.constant 0 : index
    %c0_67 = arith.constant 0 : index
    %236 = vector.load %arg7[%c0_65, %c0_66, %c0_67] : memref<2x4x256xf32, #tpu.memory_space<vmem>>, vector<1x4x256xf32>
    %237 = vector.shape_cast %236 : vector<1x4x256xf32> to vector<4x256xf32>
    %238 = vector.shape_cast %235 : vector<4x256xf32> to vector<1x4x256xf32>
    tpu.vector_store %arg7[%c0_65, %c0_66, %c0_67], %238 {strides = array<i32>} : memref<2x4x256xf32, #tpu.memory_space<vmem>>, vector<1x4x256xf32>,
    %239 = vector.extract_strided_slice %227 {offsets = [0, 256], sizes = [4, 256], strides = [1, 1]} : vector<4x512xf32> to vector<4x256xf32>
    %c1_68 = arith.constant 1 : index
    %c0_69 = arith.constant 0 : index
    %c0_70 = arith.constant 0 : index
    %240 = vector.load %arg6[%c1_68, %c0_69, %c0_70] : memref<2x4x256xf32, #tpu.memory_space<vmem>>, vector<1x4x256xf32>
    %241 = vector.shape_cast %240 : vector<1x4x256xf32> to vector<4x256xf32>
    %242 = vector.shape_cast %239 : vector<4x256xf32> to vector<1x4x256xf32>
    tpu.vector_store %arg6[%c1_68, %c0_69, %c0_70], %242 {strides = array<i32>} : memref<2x4x256xf32, #tpu.memory_space<vmem>>, vector<1x4x256xf32>,
    %243 = vector.extract_strided_slice %230 {offsets = [0, 256], sizes = [4, 256], strides = [1, 1]} : vector<4x512xf32> to vector<4x256xf32>
    %c1_71 = arith.constant 1 : index
    %c0_72 = arith.constant 0 : index
    %c0_73 = arith.constant 0 : index
    %244 = vector.load %arg7[%c1_71, %c0_72, %c0_73] : memref<2x4x256xf32, #tpu.memory_space<vmem>>, vector<1x4x256xf32>
    %245 = vector.shape_cast %244 : vector<1x4x256xf32> to vector<4x256xf32>
    %246 = vector.shape_cast %243 : vector<4x256xf32> to vector<1x4x256xf32>
    tpu.vector_store %arg7[%c1_71, %c0_72, %c0_73], %246 {strides = array<i32>} : memref<2x4x256xf32, #tpu.memory_space<vmem>>, vector<1x4x256xf32>,
    return
  }
}

</mosaic_0001>

<bundles_post_ra>
// kernel: res_block_12.1
= control target key start
LH: loop header
LB: loop body
LE: loop exit
PB: predicated region body
PF: predicated region fallthrough
CT: control target
= control target key end

     0   :  { %s1448_s28 = smov 111   ;;  %s1449_s8 = smov 112   ;;  %v1455_v4 = vmov 0.0   ;;  %v70_v5 = vlaneseq  ;;  %vm385_vm0 = vcmask 908288   ;;  %vm342_vm1 = vcmask 916480   ;;  %s2179_s0 = inlined_call_operand.vmem [shape: f32[2,8,256], index: 0, kind: input, shape index: {}]   ;;  %s2180_s5 = inlined_call_operand.vmem [shape: f32[9,1,512], index: 5, kind: input, shape index: {}]   ;;  %s2181_s1 = inlined_call_operand.vmem [shape: f32[3,8,72], index: 1, kind: input, shape index: {}]   ;;  %s2182_s3 = inlined_call_operand.vmem [shape: f32[2,8,1], index: 3, kind: input, shape index: {}]   ;;  %s2183_s4 = inlined_call_operand.vmem [shape: f32[2,8,1], index: 4, kind: input, shape index: {}]   ;;  %s2184_s7 = inlined_call_operand.vmem [shape: f32[2,4,256], index: 7, kind: output, shape index: {1}]   ;;  %s2185_s2 = inlined_call_operand.vmem [shape: f32[8,1], index: 2, kind: input, shape index: {}]   ;;  %s2186_s6 = inlined_call_operand.vmem [shape: f32[2,4,256], index: 6, kind: output, shape index: {0}]  }
   0x1   :  { %v1501_v0 = vld [vmem:[%s2179_s0 + $0x8] sm:$0xff]  ;;  %v1506_v1 = vld [vmem:[%s2179_s0] sm:$0xff]  ;;  %v1515_v2 = vld [vmem:[%s2179_s0 + $0x10] sm:$0xff]  ;;  %s1450_s9 = smov 113   ;;  %s1451_s12 = smov 127   ;;  %489 = vmatprep.mubr.f32.mxu0 %v1455_v4  ;;  %560 = vmatprep.mubr.f32.mxu1 %v1455_v4  ;;  %vm299_vm2 = vcmask 924672  }
   0x2   :  { %379 = vrot.lane.b32.xlu0 %v1501_v0, %s1448_s28  ;;  %377 = vrot.lane.b32.xlu1 %v1506_v1, %s1448_s28  ;;  %v1532_v3 = vld [vmem:[%s2179_s0 + $0x18] sm:$0xff]  ;;  %s1452_s13 = smov 1   ;;  %s1453_s14 = smov 15   ;;  %v71_v6 = vshrl.u32 %v70_v5, 7  ;;  %v1393_v11 = vld [vmem:[%s2180_s5 + $0x20] sm:$0xf] }
   0x3   :  { %s1454_s15 = smov 16   ;;  %s1456_s16 = smov 17   ;;  %v1392_v13 = vld [vmem:[%s2180_s5 + $0x1c] sm:$0xf]  ;;  %v1391_v23 = vld [vmem:[%s2180_s5 + $0x18] sm:$0xf] }
   0x4   :  { %v1584_v7 = vsub.s32 1, %v71_v6  ;;  %v1586_v8 = vsub.s32 0, %v71_v6  ;;  %v1615_v28 = vsub.s32 3, %v71_v6  ;;  %v1622_v32 = vsub.s32 2, %v71_v6  ;;  %v1390_v40 = vld [vmem:[%s2180_s5 + $0x14] sm:$0xf] }
   0x5   :  { %vm256_vm3 = vcmask 1039360   ;;  %v1389_v50 = vld [vmem:[%s2180_s5 + $0x10] sm:$0xf]  ;;  %vm189_vm4 = vcmask 7168   ;;  %vm146_vm5 = vcmask 121856   ;;  %vm103_vm6 = vcmask 130048  }
   0x6   :  { %381 = vrot.lane.b32.xlu0 %v1515_v2, %s1448_s28  ;;  %336 = vrot.lane.b32.xlu1 %v1501_v0, %s1449_s8  ;;  %v1592_v12 = vrot.slane %v1393_v11, %v1584_v7  ;;  %v1598_v14 = vrot.slane %v1393_v11, %v1586_v8  ;;  %v1604_v20 = vrot.slane %v1392_v13, %v1584_v7  ;;  %vm60_vm7 = vcmask 138240  }
   0x7   :  { %v1607_v21 = vrot.slane %v1392_v13, %v1586_v8  ;;  %v1620_v31 = vrot.slane %v1391_v23, %v1584_v7  ;;  %v1627_v37 = vrot.slane %v1391_v23, %v1586_v8  ;;  %v1630_v38 = vrot.slane %v1393_v11, %v1615_v28 }
   0x8   :  { %v1633_v39 = vrot.slane %v1393_v11, %v1622_v32  ;;  %v1645_v49 = vrot.slane %v1390_v40, %v1584_v7  ;;  %v1652_v54 = vrot.slane %v1392_v13, %v1622_v32  ;;  %v1655_v55 = vrot.slane %v1389_v50, %v1584_v7 }
   0x9   :  { %v1658_v56 = vrot.slane %v1392_v13, %v1615_v28  ;;  %v1662_v58 = vrot.slane %v1390_v40, %v1586_v8  ;;  %v1665_v59 = vrot.slane %v1389_v50, %v1586_v8  ;;  %v1668_v62 = vrot.slane %v1391_v23, %v1622_v32 }
   0xa   :  { %338 = vrot.lane.b32.xlu0 %v1515_v2, %s1449_s8  ;;  %334 = vrot.lane.b32.xlu1 %v1506_v1, %s1449_s8  ;;  %v1671_v63 = vrot.slane %v1391_v23, %v1615_v28  ;;  %v245_v11 = vmul.f32 %v1655_v55, %v1501_v0  ;;  %vm421_vm8 = vcmask 588800  }
   0xe   :  { %293 = vrot.lane.b32.xlu0 %v1501_v0, %s1450_s9  ;;  %295 = vrot.lane.b32.xlu1 %v1515_v2, %s1450_s9 }
  0x12   :  { %383 = vrot.lane.b32.xlu0 %v1532_v3, %s1448_s28  ;;  %291 = vrot.lane.b32.xlu1 %v1506_v1, %s1450_s9 }
  0x16   :  { %250 = vrot.lane.b32.xlu0 %v1501_v0, %s1451_s12  ;;  %252 = vrot.lane.b32.xlu1 %v1515_v2, %s1451_s12 }
  0x1a   :  { %340 = vrot.lane.b32.xlu0 %v1532_v3, %s1449_s8  ;;  %248 = vrot.lane.b32.xlu1 %v1506_v1, %s1451_s12 }
  0x1e   :  { %297 = vrot.lane.b32.xlu0 %v1532_v3, %s1450_s9  ;;  %183 = vrot.lane.b32.xlu1 %v1506_v1, %s1452_s13 }
  0x22   :  { %185 = vrot.lane.b32.xlu0 %v1501_v0, %s1452_s13  ;;  %254 = vrot.lane.b32.xlu1 %v1532_v3, %s1451_s12 }
  0x26   :  { %180 = vrot.lane.b32.xlu0 %v1532_v3, %s1452_s13  ;;  %140 = vrot.lane.b32.xlu1 %v1506_v1, %s1453_s14 }
  0x2a   :  { %142 = vrot.lane.b32.xlu0 %v1501_v0, %s1453_s14  ;;  %137 = vrot.lane.b32.xlu1 %v1532_v3, %s1453_s14 }
  0x2e   :  { %97 = vrot.lane.b32.xlu0 %v1506_v1, %s1454_s15  ;;  %99 = vrot.lane.b32.xlu1 %v1501_v0, %s1454_s15 }
  0x32   :  { %187 = vrot.lane.b32.xlu0 %v1515_v2, %s1452_s13  ;;  %94 = vrot.lane.b32.xlu1 %v1532_v3, %s1454_s15 }
  0x36   :  { %54 = vrot.lane.b32.xlu0 %v1506_v1, %s1456_s16  ;;  %56 = vrot.lane.b32.xlu1 %v1501_v0, %s1456_s16 }
  0x3a   :  { %144 = vrot.lane.b32.xlu0 %v1515_v2, %s1453_s14  ;;  %48 = vrot.lane.b32.xlu1 %v1532_v3, %s1456_s16 }
  0x3e   :  { %101 = vrot.lane.b32.xlu0 %v1515_v2, %s1454_s15  ;;  %58 = vrot.lane.b32.xlu1 %v1515_v2, %s1456_s16 }
  0x74   :  { %v380_v9 = vpop.permute.xlu0 %379  ;;  %v378_v10 = vpop.permute.xlu1 %377 }
  0x75   :  { %v386_v17 = vsel %vm385_vm0, %v378_v10, %v380_v9 }
  0x76   :  { %v416_v22 = vmul.f32 %v1598_v14, %v386_v17  ;;  %v244_v17 = vmul.f32 %v1665_v59, %v1506_v1 }
  0x78   :  { %v382_v15 = vpop.permute.xlu0 %381  ;;  %v337_v16 = vpop.permute.xlu1 %336 }
  0x79   :  { %v387_v18 = vsel %vm385_vm0, %v380_v9, %v382_v15 }
  0x7a   :  { %v417_v19 = vmul.f32 %v1592_v12, %v387_v18 }
  0x7c   :  { %439 = vmatprep.subr.mxu0 %v417_v19  ;;  %v339_v24 = vpop.permute.xlu0 %338  ;;  %v335_v25 = vpop.permute.xlu1 %334 }
  0x7d   :  { %v344_v26 = vsel %vm342_vm1, %v337_v16, %v339_v24  ;;  %v343_v27 = vsel %vm342_vm1, %v335_v25, %v337_v16  ;;  %440 = vmatpush1.msra.mxu0 %v416_v22 }
  0x7e   :  { %v374_v29 = vmul.f32 %v1604_v20, %v344_v26  ;;  %v373_v30 = vmul.f32 %v1607_v21, %v343_v27  ;;  %v1700_v26 = vrot.slane %v1390_v40, %v1615_v28  ;;  %v1703_v27 = vrot.slane %v1389_v50, %v1615_v28 }
  0x80   :  { %v294_v33 = vpop.permute.xlu0 %293  ;;  %441 = vmatprep.subr.mxu0 %v374_v29  ;;  %v296_v34 = vpop.permute.xlu1 %295  ;;  %v1706_v29 = vrot.slane %v1389_v50, %v1622_v32 }
  0x81   :  { %v301_v35 = vsel %vm299_vm2, %v294_v33, %v296_v34  ;;  %442 = vmatpush1.msra.mxu0 %v373_v30 }
  0x82   :  { %v331_v36 = vmul.f32 %v1620_v31, %v301_v35 }
  0x84   :  { %v384_v41 = vpop.permute.xlu0 %383  ;;  %443 = vmatprep.subr.mxu0 %v331_v36  ;;  %v292_v42 = vpop.permute.xlu1 %291 }
  0x85   :  { %v388_v43 = vsel %vm385_vm0, %v382_v15, %v384_v41  ;;  %v300_v44 = vsel %vm299_vm2, %v292_v42, %v294_v33  ;;  %v394_v45 = vsel %vm385_vm0, %v384_v41, %v378_v10  ;;  %v1679_v10 = vld [vmem:[%s2180_s5 + $0xc] sm:$0xf] }
  0x86   :  { %v330_v46 = vmul.f32 %v1627_v37, %v300_v44  ;;  %v419_v47 = vmul.f32 %v1630_v38, %v394_v45  ;;  %v418_v48 = vmul.f32 %v1633_v39, %v388_v43  ;;  %v1690_v22 = vrot.slane %v1679_v10, %v1584_v7  ;;  %v1387_v45 = vld [vmem:[%s2180_s5 + $0x8] sm:$0xf] }
  0x87   :  { %v247_v44 = vmul.f32 %v1532_v3, %v1703_v27  ;;  %v1731_v3 = vrot.slane %v1387_v45, %v1586_v8 }
  0x88   :  { %v251_v51 = vpop.permute.xlu0 %250  ;;  %444 = vmatpush1.msra.mxu0 %v330_v46  ;;  %510 = vmatprep.subr.mxu1 %v419_v47  ;;  %v253_v52 = vpop.permute.xlu1 %252  ;;  %v246_v46 = vmul.f32 %v1515_v2, %v1706_v29  ;;  %v1386_v2 = vld [vmem:[%s2180_s5 + $0x4] sm:$0xf] }
  0x89   :  { %v258_v53 = vsel %vm256_vm3, %v251_v51, %v253_v52  ;;  %511 = vmatpush1.msra.mxu1 %v418_v48 }
  0x8a   :  { %v288_v57 = vmul.f32 %v1645_v49, %v258_v53 }
  0x8c   :  { %v341_v60 = vpop.permute.xlu0 %340  ;;  %445 = vmatprep.subr.mxu0 %v288_v57  ;;  %v249_v61 = vpop.permute.xlu1 %248 }
  0x8d   :  { %v345_v5 = vsel %vm342_vm1, %v339_v24, %v341_v60  ;;  %v351_v6 = vsel %vm342_vm1, %v341_v60, %v335_v25  ;;  %v257_v9 = vsel %vm256_vm3, %v249_v61, %v251_v51  ;;  %v1695_v24 = vrot.slane %v1390_v40, %v1622_v32 }
  0x8e   :  { %v375_v13 = vmul.f32 %v1652_v54, %v345_v5  ;;  %v376_v15 = vmul.f32 %v1658_v56, %v351_v6  ;;  %v287_v16 = vmul.f32 %v1662_v58, %v257_v9  ;;  %v1713_v40 = vrot.slane %v1679_v10, %v1586_v8 }
  0x8f   :  { %v1741_v9 = vrot.slane %v1386_v2, %v1584_v7 }
  0x90   :  { %v298_v18 = vpop.permute.xlu0 %297  ;;  %446 = vmatpush1.msra.mxu0 %v287_v16  ;;  %512 = vmatprep.subr.mxu1 %v376_v15  ;;  %v184_v19 = vpop.permute.xlu1 %183 }
  0x91   :  { %v302_v23 = vsel %vm299_vm2, %v296_v34, %v298_v18  ;;  %v308_v0 = vsel %vm299_vm2, %v298_v18, %v292_v42  ;;  %513 = vmatpush1.msra.mxu1 %v375_v13  ;;  %447 = vmatprep.subr.mxu0 %v245_v11  ;;  %v1751_v18 = vrot.slane %v1679_v10, %v1615_v28 }
  0x92   :  { %v332_v1 = vmul.f32 %v1668_v62, %v302_v23  ;;  %v333_v25 = vmul.f32 %v1671_v63, %v308_v0  ;;  %448 = vmatpush1.msra.mxu0 %v244_v17  ;;  %v1747_v17 = vrot.slane %v1679_v10, %v1622_v32  ;;  %v25_v23 = vld [vmem:[%s2180_s5] sm:$0xf] }
  0x94   :  { %v186_v30 = vpop.permute.xlu0 %185  ;;  %514 = vmatprep.subr.mxu1 %v333_v25  ;;  %v255_v33 = vpop.permute.xlu1 %254 }
  0x95   :  { %v190_v34 = vsel %vm189_vm4, %v184_v19, %v186_v30  ;;  %v259_v35 = vsel %vm256_vm3, %v253_v52, %v255_v33  ;;  %v265_v36 = vsel %vm256_vm3, %v255_v33, %v249_v61  ;;  %515 = vmatpush1.msra.mxu1 %v332_v1  ;;  %v1728_v52 = vrot.slane %v1387_v45, %v1584_v7 }
  0x96   :  { %v220_v41 = vmul.f32 %v1690_v22, %v190_v34  ;;  %v289_v42 = vmul.f32 %v1695_v24, %v259_v35  ;;  %v290_v43 = vmul.f32 %v1700_v26, %v265_v36 }
  0x98   :  { %v181_v47 = vpop.permute.xlu0 %180  ;;  %516 = vmatprep.subr.mxu1 %v290_v43  ;;  %v141_v48 = vpop.permute.xlu1 %140  ;;  %449 = vmatprep.subr.mxu0 %v220_v41  ;;  %v1766_v41 = vrot.slane %v25_v23, %v1584_v7 }
  0x99   :  { %v197_v50 = vsel %vm189_vm4, %v181_v47, %v184_v19  ;;  %517 = vmatpush1.msra.mxu1 %v289_v42  ;;  %v1754_v19 = vrot.slane %v1386_v2, %v1586_v8 }
  0x9a   :  { %v219_v51 = vmul.f32 %v1713_v40, %v197_v50  ;;  %518 = vmatprep.subr.mxu1 %v247_v44 }
  0x9b   :  { %519 = vmatpush1.msra.mxu1 %v246_v46  ;;  %v1771_v46 = vrot.slane %v1387_v45, %v1622_v32 }
  0x9c   :  { %v143_v53 = vpop.permute.xlu0 %142  ;;  %v138_v57 = vpop.permute.xlu1 %137  ;;  %450 = vmatpush1.msra.mxu0 %v219_v51 }
  0x9d   :  { %v147_v60 = vsel %vm146_vm5, %v141_v48, %v143_v53  ;;  %v154_v61 = vsel %vm146_vm5, %v138_v57, %v141_v48  ;;  %v1777_v48 = vrot.slane %v25_v23, %v1586_v8  ;;  %v1789_v8 = vrot.slane %v1386_v2, %v1615_v28 }
  0x9e   :  { %v177_v5 = vmul.f32 %v1728_v52, %v147_v60  ;;  %v176_v6 = vmul.f32 %v1731_v3, %v154_v61 }
  0xa0   :  { %v98_v11 = vpop.permute.xlu0 %97  ;;  %v100_v13 = vpop.permute.xlu1 %99  ;;  %451 = vmatprep.subr.mxu0 %v177_v5  ;;  %v1783_v5 = vrot.slane %v1386_v2, %v1622_v32 }
  0xa1   :  { %v104_v15 = vsel %vm103_vm6, %v98_v11, %v100_v13  ;;  %452 = vmatpush1.msra.mxu0 %v176_v6 }
  0xa2   :  { %v134_v16 = vmul.f32 %v1741_v9, %v104_v15  ;;  %v1795_v15 = vrot.slane %v25_v23, %v1615_v28 }
  0xa4   :  { %v188_v0 = vpop.permute.xlu0 %187  ;;  %v95_v1 = vpop.permute.xlu1 %94  ;;  %453 = vmatprep.subr.mxu0 %v134_v16 }
  0xa5   :  { %v191_v25 = vsel %vm189_vm4, %v186_v30, %v188_v0  ;;  %v192_v33 = vsel %vm189_vm4, %v188_v0, %v181_v47  ;;  %v111_v34 = vsel %vm103_vm6, %v95_v1, %v98_v11  ;;  %v1774_v47 = vrot.slane %v1387_v45, %v1615_v28 }
  0xa6   :  { %v221_v10 = vmul.f32 %v1747_v17, %v191_v25  ;;  %v222_v35 = vmul.f32 %v1751_v18, %v192_v33  ;;  %v133_v36 = vmul.f32 %v1754_v19, %v111_v34  ;;  %v1800_v33 = vrot.slane %v25_v23, %v1622_v32 }
  0xa8   :  { %v55_v42 = vpop.permute.xlu0 %54  ;;  %520 = vmatprep.subr.mxu1 %v222_v35  ;;  %v57_v43 = vpop.permute.xlu1 %56  ;;  %454 = vmatpush1.msra.mxu0 %v133_v36 }
  0xa9   :  { %v61_v30 = vsel %vm60_vm7, %v55_v42, %v57_v43  ;;  %521 = vmatpush1.msra.mxu1 %v221_v10 }
  0xaa   :  { %v91_v44 = vmul.f32 %v1766_v41, %v61_v30 }
  0xac   :  { %v145_v7 = vpop.permute.xlu0 %144  ;;  %v49_v50 = vpop.permute.xlu1 %48  ;;  %455 = vmatprep.subr.mxu0 %v91_v44 }
  0xad   :  { %v148_v51 = vsel %vm146_vm5, %v143_v53, %v145_v7  ;;  %v149_v60 = vsel %vm146_vm5, %v145_v7, %v138_v57  ;;  %v68_v61 = vsel %vm60_vm7, %v49_v50, %v55_v42  ;;  %v420_v53 = vld [vmem:[%s2181_s1] sm:$0xff] }
  0xae   :  { %v178_v6 = vmul.f32 %v1771_v46, %v148_v51  ;;  %v179_v45 = vmul.f32 %v1774_v47, %v149_v60  ;;  %v90_v11 = vmul.f32 %v1777_v48, %v68_v61 }
  0xb0   :  { %v102_v57 = vpop.permute.xlu0 %101  ;;  %522 = vmatprep.subr.mxu1 %v179_v45  ;;  %v59_v16 = vpop.permute.xlu1 %58  ;;  %456 = vmatpush1.msra.mxu0 %v90_v11 }
  0xb1   :  { %v105_v0 = vsel %vm103_vm6, %v100_v13, %v102_v57  ;;  %v106_v25 = vsel %vm103_vm6, %v102_v57, %v95_v1  ;;  %v63_v2 = vsel %vm60_vm7, %v59_v16, %v49_v50  ;;  %523 = vmatpush1.msra.mxu1 %v178_v6  ;;  %v62_v35 = vsel %vm60_vm7, %v57_v43, %v59_v16 }
  0xb2   :  { %v135_v34 = vmul.f32 %v1783_v5, %v105_v0  ;;  %v136_v10 = vmul.f32 %v1789_v8, %v106_v25  ;;  %1396 = vmatmul.mubr.msk.f32.vlgmr.msra.gmra.mxu0 %vm421_vm8, %v420_v53  ;;  %v93_v28 = vmul.f32 %v1795_v15, %v63_v2  ;;  %v92_v13 = vmul.f32 %v1800_v33, %v62_v35  ;;  %v588_v35 = vld [vmem:[%s2182_s3] sm:$0xff] }
  0xb3   :  { %862 = vmatprep.mubr.f32.mxu0 %v1455_v4  ;;  %v1457_v25 = vmov 0  }
  0xb4   :  { %524 = vmatprep.subr.mxu1 %v136_v10  ;;  %1422 = vset.pattern.permute.xlu0 %v1457_v25 }
  0xb5   :  { %525 = vmatpush1.msra.mxu1 %v135_v34  ;;  %1423 = vset.pattern.permute.xlu1 %v1457_v25 }
  0xb6   :  { %526 = vmatprep.subr.mxu1 %v93_v28 }
  0xb7   :  { %527 = vmatpush1.msra.mxu1 %v92_v13 }
  0xb8   :  { %1397 = vmatmul.mubr.msk.f32.vlgmr.msra.gmra.mxu1 %vm421_vm8, %v420_v53 }
  0xb9   :  { %933 = vmatprep.mubr.f32.mxu1 %v1455_v4 }
 0x172   :  { %v491_v32 = vpop.f32.mrf.mxu0 }
 0x174   :  { %v493_v23 = vpop.f32.mrf.mxu0 }
 0x175   :  { %v567_v1 = vadd.f32 %v493_v23, %v491_v32 }
 0x178   :  { %v562_v36 = vpop.f32.mrf.mxu1 }
 0x179   :  { %v568_v42 = vadd.f32 %v567_v1, %v562_v36  ;;  %v592_v1 = vld [vmem:[%s2183_s4] sm:$0xff] }
 0x17a   :  { %v564_v43 = vpop.f32.mrf.mxu1 }
 0x17b   :  { %v569_v30 = vadd.f32 %v568_v42, %v564_v43 }
 0x17d   :  { %570 = vadd.xlane.f32.xlu0 %v569_v30 }
 0x206   :  { %v571_v44 = vpop.xlane.xlu0 %570 }
 0x207   :  { %v573_v7 = vmul.f32 0.001953125, %v571_v44 }
 0x209   :  { %v574_v50 = vsub.f32 %v491_v32, %v573_v7  ;;  %v575_v51 = vsub.f32 %v493_v23, %v573_v7  ;;  %v576_v60 = vsub.f32 %v562_v36, %v573_v7  ;;  %v577_v61 = vsub.f32 %v564_v43, %v573_v7 }
 0x20b   :  { %v578_v6 = vmul.f32 %v574_v50, %v574_v50  ;;  %v579_v45 = vmul.f32 %v575_v51, %v575_v51  ;;  %v580_v11 = vmul.f32 %v576_v60, %v576_v60  ;;  %v581_v57 = vmul.f32 %v577_v61, %v577_v61 }
 0x20d   :  { %v582_v53 = vadd.f32 %v579_v45, %v578_v6 }
 0x20f   :  { %v583_v16 = vadd.f32 %v582_v53, %v580_v11 }
 0x211   :  { %v584_v0 = vadd.f32 %v583_v16, %v581_v57 }
 0x213   :  { %585 = vadd.xlane.f32.xlu1 %v584_v0 }
 0x29c   :  { %v586_v2 = vpop.xlane.xlu1 %585 }
 0x29d   :  { %v587_v34 = vmul.f32 0.001953125, %v586_v2 }
 0x29f   :  { %v589_v10 = vadd.f32 1e-05, %v587_v34 }
 0x2a1   :  { %1424 = vrsqrt.f32 %v589_v10 }
 0x2ae   :  { %v1425_v28 = vpop.eup %1424 }
 0x2af   :  { %v591_v13 = vmul.f32 %v1425_v28, %v588_v35 }
 0x2b1   :  { %597 = vperm.xlu0 %1422, %v591_v13   ;;  %v593_v42 = vmul.f32 %v591_v13, %v573_v7 }
 0x2b3   :  { %v594_v30 = vsub.f32 %v592_v1, %v593_v42 }
 0x2b5   :  { %606 = vperm.xlu1 %1423, %v594_v30  }
 0x32c   :  { %v598_v44 = vpop.permute.xlu0 %597 }
 0x32d   :  { %v601_v50 = vmul.f32 %v598_v44, %v493_v23  ;;  %v602_v60 = vmul.f32 %v598_v44, %v562_v36  ;;  %v603_v61 = vmul.f32 %v598_v44, %v564_v43  ;;  %v600_v57 = vmul.f32 %v598_v44, %v491_v32 }
 0x330   :  { %v607_v51 = vpop.permute.xlu1 %606 }
 0x331   :  { %v610_v6 = vadd.f32 %v607_v51, %v601_v50  ;;  %v611_v45 = vadd.f32 %v607_v51, %v602_v60  ;;  %v612_v11 = vadd.f32 %v607_v51, %v603_v61  ;;  %v609_v7 = vadd.f32 %v607_v51, %v600_v57 }
 0x333   :  { %v1818_v53 = vmax.f32 %v610_v6, 0.0  ;;  %v1824_v16 = vmax.f32 %v611_v45, 0.0  ;;  %v1826_v0 = vmax.f32 %v612_v11, 0.0  ;;  %v1832_v23 = vmax.f32 %v609_v7, 0.0 }
 0x335   :  { %732 = vrot.lane.b32.xlu0 %v1818_v53, %s1450_s9  ;;  %774 = vrot.lane.b32.xlu1 %v1818_v53, %s1448_s28 }
 0x339   :  { %778 = vrot.lane.b32.xlu0 %v1826_v0, %s1448_s28  ;;  %776 = vrot.lane.b32.xlu1 %v1824_v16, %s1448_s28 }
 0x33d   :  { %711 = vrot.lane.b32.xlu0 %v1818_v53, %s1451_s12  ;;  %772 = vrot.lane.b32.xlu1 %v1832_v23, %s1448_s28 }
 0x341   :  { %757 = vrot.lane.b32.xlu0 %v1826_v0, %s1449_s8  ;;  %753 = vrot.lane.b32.xlu1 %v1818_v53, %s1449_s8 }
 0x345   :  { %736 = vrot.lane.b32.xlu0 %v1826_v0, %s1450_s9  ;;  %755 = vrot.lane.b32.xlu1 %v1824_v16, %s1449_s8 }
 0x349   :  { %689 = vrot.lane.b32.xlu0 %v1818_v53, %s1452_s13  ;;  %751 = vrot.lane.b32.xlu1 %v1832_v23, %s1449_s8 }
 0x34d   :  { %684 = vrot.lane.b32.xlu0 %v1826_v0, %s1452_s13  ;;  %734 = vrot.lane.b32.xlu1 %v1824_v16, %s1450_s9 }
 0x351   :  { %668 = vrot.lane.b32.xlu0 %v1818_v53, %s1453_s14  ;;  %730 = vrot.lane.b32.xlu1 %v1832_v23, %s1450_s9 }
 0x355   :  { %645 = vrot.lane.b32.xlu0 %v1832_v23, %s1454_s15  ;;  %713 = vrot.lane.b32.xlu1 %v1824_v16, %s1451_s12 }
 0x359   :  { %691 = vrot.lane.b32.xlu0 %v1824_v16, %s1452_s13  ;;  %709 = vrot.lane.b32.xlu1 %v1832_v23, %s1451_s12 }
 0x35d   :  { %624 = vrot.lane.b32.xlu0 %v1832_v23, %s1456_s16  ;;  %687 = vrot.lane.b32.xlu1 %v1832_v23, %s1452_s13 }
 0x361   :  { %670 = vrot.lane.b32.xlu0 %v1824_v16, %s1453_s14  ;;  %715 = vrot.lane.b32.xlu1 %v1826_v0, %s1451_s12 }
 0x365   :  { %649 = vrot.lane.b32.xlu0 %v1824_v16, %s1454_s15  ;;  %666 = vrot.lane.b32.xlu1 %v1832_v23, %s1453_s14 }
 0x369   :  { %663 = vrot.lane.b32.xlu1 %v1826_v0, %s1453_s14 }
 0x36d   :  { %647 = vrot.lane.b32.xlu1 %v1818_v53, %s1454_s15 }
 0x371   :  { %642 = vrot.lane.b32.xlu1 %v1826_v0, %s1454_s15 }
 0x375   :  { %626 = vrot.lane.b32.xlu1 %v1818_v53, %s1456_s16 }
 0x379   :  { %618 = vrot.lane.b32.xlu1 %v1826_v0, %s1456_s16 }
 0x37d   :  { %628 = vrot.lane.b32.xlu1 %v1824_v16, %s1456_s16 }
 0x3a7   :  { %v733_v32 = vpop.permute.xlu0 %732  ;;  %v775_v36 = vpop.permute.xlu1 %774 }
 0x3ab   :  { %v779_v43 = vpop.permute.xlu0 %778  ;;  %v777_v25 = vpop.permute.xlu1 %776 }
 0x3ac   :  { %v781_v2 = vsel %vm385_vm0, %v775_v36, %v777_v25  ;;  %v782_v10 = vsel %vm385_vm0, %v777_v25, %v779_v43 }
 0x3ad   :  { %v790_v34 = vmul.f32 %v781_v2, %v1592_v12  ;;  %v791_v44 = vmul.f32 %v782_v10, %v1633_v39 }
 0x3af   :  { %v712_v35 = vpop.permute.xlu0 %711  ;;  %812 = vmatprep.subr.mxu0 %v790_v34  ;;  %v773_v28 = vpop.permute.xlu1 %772 }
 0x3b0   :  { %v780_v13 = vsel %vm385_vm0, %v773_v28, %v775_v36  ;;  %v788_v1 = vsel %vm385_vm0, %v779_v43, %v773_v28 }
 0x3b1   :  { %v789_v42 = vmul.f32 %v780_v13, %v1598_v14  ;;  %v792_v30 = vmul.f32 %v788_v1, %v1630_v38 }
 0x3b3   :  { %v758_v50 = vpop.permute.xlu0 %757  ;;  %813 = vmatpush1.msra.mxu0 %v789_v42  ;;  %883 = vmatprep.subr.mxu1 %v792_v30  ;;  %v754_v51 = vpop.permute.xlu1 %753 }
 0x3b4   :  { %884 = vmatpush1.msra.mxu1 %v791_v44 }
 0x3b7   :  { %v737_v60 = vpop.permute.xlu0 %736  ;;  %v756_v61 = vpop.permute.xlu1 %755 }
 0x3b8   :  { %v760_v6 = vsel %vm342_vm1, %v754_v51, %v756_v61  ;;  %v761_v11 = vsel %vm342_vm1, %v756_v61, %v758_v50 }
 0x3b9   :  { %v769_v45 = vmul.f32 %v760_v6, %v1604_v20  ;;  %v770_v34 = vmul.f32 %v761_v11, %v1652_v54 }
 0x3bb   :  { %v690_v57 = vpop.permute.xlu0 %689  ;;  %814 = vmatprep.subr.mxu0 %v769_v45  ;;  %v752_v7 = vpop.permute.xlu1 %751 }
 0x3bc   :  { %v759_v36 = vsel %vm342_vm1, %v752_v7, %v754_v51  ;;  %v767_v43 = vsel %vm342_vm1, %v758_v50, %v752_v7 }
 0x3bd   :  { %v768_v25 = vmul.f32 %v759_v36, %v1607_v21  ;;  %v771_v2 = vmul.f32 %v767_v43, %v1658_v56 }
 0x3bf   :  { %v685_v10 = vpop.permute.xlu0 %684  ;;  %815 = vmatpush1.msra.mxu0 %v768_v25  ;;  %885 = vmatprep.subr.mxu1 %v771_v2  ;;  %v735_v28 = vpop.permute.xlu1 %734 }
 0x3c0   :  { %v739_v13 = vsel %vm299_vm2, %v733_v32, %v735_v28  ;;  %886 = vmatpush1.msra.mxu1 %v770_v34  ;;  %v740_v42 = vsel %vm299_vm2, %v735_v28, %v737_v60  ;;  %v706_v34 = vmul.f32 %v1818_v53, %v1655_v55 }
 0x3c1   :  { %v748_v1 = vmul.f32 %v739_v13, %v1620_v31  ;;  %v749_v45 = vmul.f32 %v740_v42, %v1668_v62  ;;  %v705_v13 = vmul.f32 %v1832_v23, %v1665_v59 }
 0x3c3   :  { %v669_v30 = vpop.permute.xlu0 %668  ;;  %816 = vmatprep.subr.mxu0 %v748_v1  ;;  %v731_v44 = vpop.permute.xlu1 %730 }
 0x3c4   :  { %v738_v50 = vsel %vm299_vm2, %v731_v44, %v733_v32  ;;  %v746_v51 = vsel %vm299_vm2, %v737_v60, %v731_v44 }
 0x3c5   :  { %v747_v61 = vmul.f32 %v738_v50, %v1627_v37  ;;  %v750_v6 = vmul.f32 %v746_v51, %v1671_v63 }
 0x3c7   :  { %v1914_v11 = vpop.permute.xlu0 %645  ;;  %817 = vmatpush1.msra.mxu0 %v747_v61  ;;  %887 = vmatprep.subr.mxu1 %v750_v6  ;;  %v714_v7 = vpop.permute.xlu1 %713 }
 0x3c8   :  { %v718_v36 = vsel %vm256_vm3, %v712_v35, %v714_v7  ;;  %888 = vmatpush1.msra.mxu1 %v749_v45 }
 0x3c9   :  { %v727_v43 = vmul.f32 %v718_v36, %v1645_v49 }
 0x3cb   :  { %818 = vmatprep.subr.mxu0 %v727_v43  ;;  %v710_v32 = vpop.permute.xlu1 %709  ;;  %v692_v25 = vpop.permute.xlu0 %691 }
 0x3cc   :  { %v717_v60 = vsel %vm256_vm3, %v710_v32, %v712_v35  ;;  %v695_v45 = vsel %vm189_vm4, %v692_v25, %v685_v10  ;;  %v694_v36 = vsel %vm189_vm4, %v690_v57, %v692_v25 }
 0x3cd   :  { %v726_v2 = vmul.f32 %v717_v60, %v1662_v58  ;;  %v708_v60 = vmul.f32 %v1826_v0, %v1703_v27 }
 0x3cf   :  { %819 = vmatpush1.msra.mxu0 %v726_v2  ;;  %v688_v28 = vpop.permute.xlu1 %687  ;;  %v625_v35 = vpop.permute.xlu0 %624 }
 0x3d0   :  { %v693_v1 = vsel %vm189_vm4, %v688_v28, %v690_v57  ;;  %v700_v42 = vsel %vm189_vm4, %v685_v10, %v688_v28  ;;  %820 = vmatprep.subr.mxu0 %v706_v34  ;;  %v703_v10 = vmul.f32 %v694_v36, %v1747_v17 }
 0x3d1   :  { %v701_v44 = vmul.f32 %v700_v42, %v1713_v40  ;;  %v702_v50 = vmul.f32 %v693_v1, %v1690_v22  ;;  %821 = vmatpush1.msra.mxu0 %v705_v13 }
 0x3d3   :  { %v716_v51 = vpop.permute.xlu1 %715  ;;  %822 = vmatprep.subr.mxu0 %v702_v50  ;;  %v671_v2 = vpop.permute.xlu0 %670 }
 0x3d4   :  { %v719_v53 = vsel %vm256_vm3, %v714_v7, %v716_v51  ;;  %v725_v61 = vsel %vm256_vm3, %v716_v51, %v710_v32  ;;  %823 = vmatpush1.msra.mxu0 %v701_v44  ;;  %v707_v7 = vmul.f32 %v1824_v16, %v1706_v29  ;;  %v704_v32 = vmul.f32 %v695_v45, %v1751_v18 }
 0x3d5   :  { %v728_v23 = vmul.f32 %v719_v53, %v1695_v24  ;;  %v729_v6 = vmul.f32 %v725_v61, %v1700_v26  ;;  %v673_v57 = vsel %vm146_vm5, %v669_v30, %v671_v2 }
 0x3d6   :  { %v682_v42 = vmul.f32 %v673_v57, %v1771_v46 }
 0x3d7   :  { %889 = vmatprep.subr.mxu1 %v729_v6  ;;  %v667_v43 = vpop.permute.xlu1 %666  ;;  %v650_v51 = vpop.permute.xlu0 %649 }
 0x3d8   :  { %v672_v34 = vsel %vm146_vm5, %v667_v43, %v669_v30  ;;  %890 = vmatpush1.msra.mxu1 %v728_v23 }
 0x3d9   :  { %v681_v28 = vmul.f32 %v672_v34, %v1728_v52  ;;  %891 = vmatprep.subr.mxu1 %v708_v60 }
 0x3da   :  { %892 = vmatpush1.msra.mxu1 %v707_v7 }
 0x3db   :  { %893 = vmatprep.subr.mxu1 %v704_v32  ;;  %v664_v25 = vpop.permute.xlu1 %663  ;;  %824 = vmatprep.subr.mxu0 %v681_v28  ;;  %v1398_v28 = vld [vmem:[%s2181_s1 + $0x8] sm:$0xff] }
 0x3dc   :  { %v674_v0 = vsel %vm146_vm5, %v671_v2, %v664_v25  ;;  %v679_v13 = vsel %vm146_vm5, %v664_v25, %v667_v43  ;;  %894 = vmatpush1.msra.mxu1 %v703_v10 }
 0x3dd   :  { %v680_v16 = vmul.f32 %v679_v13, %v1731_v3  ;;  %v683_v1 = vmul.f32 %v674_v0, %v1774_v47 }
 0x3df   :  { %895 = vmatprep.subr.mxu1 %v683_v1  ;;  %v648_v44 = vpop.permute.xlu1 %647  ;;  %825 = vmatpush1.msra.mxu0 %v680_v16 }
 0x3e0   :  { %v651_v30 = vsel %vm103_vm6, %v1914_v11, %v648_v44  ;;  %896 = vmatpush1.msra.mxu1 %v682_v42  ;;  %v652_v53 = vsel %vm103_vm6, %v648_v44, %v650_v51 }
 0x3e1   :  { %v660_v50 = vmul.f32 %v651_v30, %v1741_v9  ;;  %v661_v43 = vmul.f32 %v652_v53, %v1783_v5 }
 0x3e3   :  { %v643_v61 = vpop.permute.xlu1 %642  ;;  %826 = vmatprep.subr.mxu0 %v660_v50 }
 0x3e4   :  { %v653_v23 = vsel %vm103_vm6, %v650_v51, %v643_v61  ;;  %v658_v6 = vsel %vm103_vm6, %v643_v61, %v1914_v11 }
 0x3e5   :  { %v659_v45 = vmul.f32 %v658_v6, %v1754_v19  ;;  %v662_v36 = vmul.f32 %v653_v23, %v1789_v8 }
 0x3e7   :  { %897 = vmatprep.subr.mxu1 %v662_v36  ;;  %v627_v60 = vpop.permute.xlu1 %626  ;;  %827 = vmatpush1.msra.mxu0 %v659_v45 }
 0x3e8   :  { %v630_v2 = vsel %vm60_vm7, %v625_v35, %v627_v60  ;;  %898 = vmatpush1.msra.mxu1 %v661_v43 }
 0x3e9   :  { %v639_v34 = vmul.f32 %v630_v2, %v1766_v41 }
 0x3eb   :  { %v619_v7 = vpop.permute.xlu1 %618  ;;  %828 = vmatprep.subr.mxu0 %v639_v34 }
 0x3ec   :  { %v637_v32 = vsel %vm60_vm7, %v619_v7, %v625_v35 }
 0x3ed   :  { %v638_v11 = vmul.f32 %v637_v32, %v1777_v48 }
 0x3ef   :  { %v629_v10 = vpop.permute.xlu1 %628  ;;  %829 = vmatpush1.msra.mxu0 %v638_v11 }
 0x3f0   :  { %v631_v57 = vsel %vm60_vm7, %v627_v60, %v629_v10  ;;  %v632_v25 = vsel %vm60_vm7, %v629_v10, %v619_v7  ;;  %1399 = vmatmul.mubr.msk.f32.vlgmr.msra.gmra.mxu0 %vm421_vm8, %v1398_v28  ;;  %v1401_v10 = vld [vmem:[%s2182_s3 + $0x8] sm:$0xff] }
 0x3f1   :  { %v640_v0 = vmul.f32 %v631_v57, %v1800_v33  ;;  %v641_v13 = vmul.f32 %v632_v25, %v1795_v15  ;;  %1242 = vmatprep.mubr.f32.mxu0 %v1455_v4 }
 0x3f3   :  { %899 = vmatprep.subr.mxu1 %v641_v13 }
 0x3f4   :  { %900 = vmatpush1.msra.mxu1 %v640_v0  ;;  %v1402_v0 = vld [vmem:[%s2183_s4 + $0x8] sm:$0xff] }
 0x3f5   :  { %1400 = vmatmul.mubr.msk.f32.vlgmr.msra.gmra.mxu1 %vm421_vm8, %v1398_v28 }
 0x3f6   :  { %1313 = vmatprep.mubr.f32.mxu1 %v1455_v4 }
 0x4b0   :  { %v864_v35 = vpop.f32.mrf.mxu0 }
 0x4b2   :  { %v866_v16 = vpop.f32.mrf.mxu0 }
 0x4b3   :  { %v940_v1 = vadd.f32 %v866_v16, %v864_v35 }
 0x4b5   :  { %v935_v42 = vpop.f32.mrf.mxu1 }
 0x4b6   :  { %v941_v44 = vadd.f32 %v940_v1, %v935_v42 }
 0x4b7   :  { %v937_v30 = vpop.f32.mrf.mxu1 }
 0x4b8   :  { %v942_v50 = vadd.f32 %v941_v44, %v937_v30 }
 0x4ba   :  { %943 = vadd.xlane.f32.xlu0 %v942_v50 }
 0x543   :  { %v944_v51 = vpop.xlane.xlu0 %943 }
 0x544   :  { %v945_v53 = vmul.f32 0.001953125, %v944_v51 }
 0x546   :  { %v946_v61 = vsub.f32 %v864_v35, %v945_v53  ;;  %v947_v23 = vsub.f32 %v866_v16, %v945_v53  ;;  %v948_v6 = vsub.f32 %v935_v42, %v945_v53  ;;  %v949_v45 = vsub.f32 %v937_v30, %v945_v53 }
 0x548   :  { %v950_v36 = vmul.f32 %v946_v61, %v946_v61  ;;  %v951_v43 = vmul.f32 %v947_v23, %v947_v23  ;;  %v952_v60 = vmul.f32 %v948_v6, %v948_v6  ;;  %v953_v34 = vmul.f32 %v949_v45, %v949_v45 }
 0x54a   :  { %v954_v2 = vadd.f32 %v951_v43, %v950_v36 }
 0x54c   :  { %v955_v4 = vadd.f32 %v954_v2, %v952_v60 }
 0x54e   :  { %v956_v7 = vadd.f32 %v955_v4, %v953_v34 }
 0x550   :  { %957 = vadd.xlane.f32.xlu1 %v956_v7 }
 0x5d9   :  { %v958_v32 = vpop.xlane.xlu1 %957 }
 0x5da   :  { %v959_v11 = vmul.f32 0.001953125, %v958_v32 }
 0x5dc   :  { %v962_v28 = vadd.f32 1e-05, %v959_v11  ;;  %v2011_v11 = vld [vmem:[%s2179_s0 + $0x18] sm:$0xff] }
 0x5de   :  { %1426 = vrsqrt.f32 %v962_v28 }
 0x5eb   :  { %v1427_v57 = vpop.eup %1426 }
 0x5ec   :  { %v964_v25 = vmul.f32 %v1427_v57, %v1401_v10 }
 0x5ee   :  { %971 = vperm.xlu0 %1422, %v964_v25   ;;  %v967_v13 = vmul.f32 %v964_v25, %v945_v53  ;;  %v2004_v53 = vld [vmem:[%s2179_s0 + $0x10] sm:$0xff]  ;;  %v991_v25 = vld [vmem:[%s2185_s2] sm:$0xff] }
 0x5f0   :  { %v968_v1 = vsub.f32 %v1402_v0, %v967_v13 }
 0x5f2   :  { %980 = vperm.xlu1 %1423, %v968_v1  }
 0x669   :  { %v972_v44 = vpop.permute.xlu0 %971 }
 0x66a   :  { %v974_v50 = vmul.f32 %v972_v44, %v864_v35  ;;  %v975_v51 = vmul.f32 %v972_v44, %v866_v16  ;;  %v976_v61 = vmul.f32 %v972_v44, %v935_v42  ;;  %v977_v23 = vmul.f32 %v972_v44, %v937_v30  ;;  %v1990_v35 = vld [vmem:[%s2179_s0] sm:$0xff]  ;;  %v1997_v42 = vld [vmem:[%s2179_s0 + $0x8] sm:$0xff] }
 0x66d   :  { %v981_v6 = vpop.permute.xlu1 %980 }
 0x66e   :  { %v983_v45 = vadd.f32 %v981_v6, %v974_v50  ;;  %v984_v36 = vadd.f32 %v981_v6, %v975_v51  ;;  %v985_v43 = vadd.f32 %v981_v6, %v976_v61  ;;  %v986_v60 = vadd.f32 %v981_v6, %v977_v23 }
 0x670   :  { %v1979_v2 = vmax.f32 %v983_v45, 0.0  ;;  %v1981_v34 = vmax.f32 %v984_v36, 0.0  ;;  %v1983_v4 = vmax.f32 %v985_v43, 0.0  ;;  %v1985_v7 = vmax.f32 %v986_v60, 0.0 }
 0x672   :  { %v1352_v16 = vadd.f32 %v1990_v35, %v1979_v2  ;;  %v1353_v30 = vadd.f32 %v1997_v42, %v1981_v34  ;;  %v1354_v32 = vadd.f32 %v2004_v53, %v1983_v4  ;;  %v1355_v28 = vadd.f32 %v2011_v11, %v1985_v7  ;;  %1149 = vrot.lane.b32.xlu1 %v1981_v34, %s1448_s28 }
 0x673   :  { %1147 = vrot.lane.b32.xlu0 %v1979_v2, %s1448_s28 }
 0x674   :  { %v1363_v10 = vcombine.high %v1352_v16, %v1353_v30  ;;  %v1374_v57 = vcombine.high %v1354_v32, %v1355_v28 }
 0x676   :  { %1365 = vst [vmem:[%s2184_s7] sm:$0xff] %v1363_v10  ;;  %1411 = vst [vmem:[%s2184_s7 + $0x8] sm:$0xff] %v1374_v57  ;;  %1153 = vrot.lane.b32.xlu1 %v1985_v7, %s1448_s28 }
 0x677   :  { %1151 = vrot.lane.b32.xlu0 %v1983_v4, %s1448_s28 }
 0x67a   :  { %1128 = vrot.lane.b32.xlu1 %v1981_v34, %s1449_s8 }
 0x67b   :  { %1126 = vrot.lane.b32.xlu0 %v1979_v2, %s1449_s8 }
 0x67e   :  { %1132 = vrot.lane.b32.xlu1 %v1985_v7, %s1449_s8 }
 0x67f   :  { %1130 = vrot.lane.b32.xlu0 %v1983_v4, %s1449_s8 }
 0x682   :  { %1107 = vrot.lane.b32.xlu1 %v1981_v34, %s1450_s9 }
 0x683   :  { %1105 = vrot.lane.b32.xlu0 %v1979_v2, %s1450_s9 }
 0x686   :  { %1111 = vrot.lane.b32.xlu1 %v1985_v7, %s1450_s9 }
 0x687   :  { %1109 = vrot.lane.b32.xlu0 %v1983_v4, %s1450_s9 }
 0x68a   :  { %1086 = vrot.lane.b32.xlu1 %v1981_v34, %s1451_s12 }
 0x68b   :  { %1084 = vrot.lane.b32.xlu0 %v1979_v2, %s1451_s12 }
 0x68e   :  { %1090 = vrot.lane.b32.xlu1 %v1985_v7, %s1451_s12 }
 0x68f   :  { %1088 = vrot.lane.b32.xlu0 %v1983_v4, %s1451_s12 }
 0x692   :  { %1062 = vrot.lane.b32.xlu1 %v1979_v2, %s1452_s13 }
 0x693   :  { %1059 = vrot.lane.b32.xlu0 %v1985_v7, %s1452_s13 }
 0x696   :  { %1066 = vrot.lane.b32.xlu1 %v1983_v4, %s1452_s13 }
 0x697   :  { %1064 = vrot.lane.b32.xlu0 %v1981_v34, %s1452_s13 }
 0x69a   :  { %1041 = vrot.lane.b32.xlu1 %v1979_v2, %s1453_s14 }
 0x69b   :  { %1038 = vrot.lane.b32.xlu0 %v1985_v7, %s1453_s14 }
 0x69e   :  { %1045 = vrot.lane.b32.xlu1 %v1983_v4, %s1453_s14 }
 0x69f   :  { %1043 = vrot.lane.b32.xlu0 %v1981_v34, %s1453_s14 }
 0x6a2   :  { %1020 = vrot.lane.b32.xlu1 %v1979_v2, %s1454_s15 }
 0x6a3   :  { %1017 = vrot.lane.b32.xlu0 %v1985_v7, %s1454_s15 }
 0x6a6   :  { %1024 = vrot.lane.b32.xlu1 %v1983_v4, %s1454_s15 }
 0x6a7   :  { %1022 = vrot.lane.b32.xlu0 %v1981_v34, %s1454_s15 }
 0x6aa   :  { %999 = vrot.lane.b32.xlu1 %v1979_v2, %s1456_s16 }
 0x6ab   :  { %993 = vrot.lane.b32.xlu0 %v1985_v7, %s1456_s16 }
 0x6ae   :  { %1003 = vrot.lane.b32.xlu1 %v1983_v4, %s1456_s16 }
 0x6af   :  { %1001 = vrot.lane.b32.xlu0 %v1981_v34, %s1456_s16 }
 0x6b3   :  { %1172 = vperm.xlu0 %1422, %v991_v25  }
 0x6e4   :  { %v1150_v0 = vpop.permute.xlu1 %1149 }
 0x6e5   :  { %v1148_v13 = vpop.permute.xlu0 %1147 }
 0x6e6   :  { %v1155_v44 = vsel %vm385_vm0, %v1148_v13, %v1150_v0 }
 0x6e7   :  { %v1164_v43 = vmul.f32 %v1155_v44, %v1598_v14 }
 0x6e8   :  { %v1154_v1 = vpop.permute.xlu1 %1153 }
 0x6e9   :  { %v1163_v50 = vsel %vm385_vm0, %v1154_v1, %v1148_v13  ;;  %v1152_v51 = vpop.permute.xlu0 %1151 }
 0x6ea   :  { %v1167_v61 = vmul.f32 %v1163_v50, %v1630_v38  ;;  %v1156_v23 = vsel %vm385_vm0, %v1150_v0, %v1152_v51  ;;  %v1157_v6 = vsel %vm385_vm0, %v1152_v51, %v1154_v1 }
 0x6eb   :  { %v1165_v45 = vmul.f32 %v1156_v23, %v1592_v12  ;;  %v1166_v36 = vmul.f32 %v1157_v6, %v1633_v39 }
 0x6ec   :  { %v1129_v60 = vpop.permute.xlu1 %1128  ;;  %1263 = vmatprep.subr.mxu1 %v1167_v61 }
 0x6ed   :  { %1192 = vmatprep.subr.mxu0 %v1165_v45  ;;  %v1127_v16 = vpop.permute.xlu0 %1126  ;;  %1264 = vmatpush1.msra.mxu1 %v1166_v36 }
 0x6ee   :  { %1193 = vmatpush1.msra.mxu0 %v1164_v43  ;;  %v1134_v32 = vsel %vm342_vm1, %v1127_v16, %v1129_v60 }
 0x6ef   :  { %v1143_v25 = vmul.f32 %v1134_v32, %v1607_v21 }
 0x6f0   :  { %v1133_v30 = vpop.permute.xlu1 %1132 }
 0x6f1   :  { %v1142_v38 = vsel %vm342_vm1, %v1133_v30, %v1127_v16  ;;  %v1131_v28 = vpop.permute.xlu0 %1130 }
 0x6f2   :  { %v1146_v10 = vmul.f32 %v1142_v38, %v1658_v56  ;;  %v1135_v12 = vsel %vm342_vm1, %v1129_v60, %v1131_v28  ;;  %v1136_v39 = vsel %vm342_vm1, %v1131_v28, %v1133_v30  ;;  %v1083_v28 = vmul.f32 %v1985_v7, %v1703_v27 }
 0x6f3   :  { %v1144_v14 = vmul.f32 %v1135_v12, %v1604_v20  ;;  %v1145_v57 = vmul.f32 %v1136_v39, %v1652_v54  ;;  %v1082_v12 = vmul.f32 %v1983_v4, %v1706_v29 }
 0x6f4   :  { %v1108_v0 = vpop.permute.xlu1 %1107  ;;  %1265 = vmatprep.subr.mxu1 %v1146_v10 }
 0x6f5   :  { %1194 = vmatprep.subr.mxu0 %v1144_v14  ;;  %v1106_v13 = vpop.permute.xlu0 %1105  ;;  %1266 = vmatpush1.msra.mxu1 %v1145_v57 }
 0x6f6   :  { %1195 = vmatpush1.msra.mxu0 %v1143_v25  ;;  %v1113_v44 = vsel %vm299_vm2, %v1106_v13, %v1108_v0 }
 0x6f7   :  { %v1122_v23 = vmul.f32 %v1113_v44, %v1627_v37 }
 0x6f8   :  { %v1112_v1 = vpop.permute.xlu1 %1111 }
 0x6f9   :  { %v1121_v56 = vsel %vm299_vm2, %v1112_v1, %v1106_v13  ;;  %v1110_v50 = vpop.permute.xlu0 %1109 }
 0x6fa   :  { %v1125_v51 = vmul.f32 %v1121_v56, %v1671_v63  ;;  %v1114_v20 = vsel %vm299_vm2, %v1108_v0, %v1110_v50  ;;  %v1115_v54 = vsel %vm299_vm2, %v1110_v50, %v1112_v1 }
 0x6fb   :  { %v1123_v21 = vmul.f32 %v1114_v20, %v1620_v31  ;;  %v1124_v61 = vmul.f32 %v1115_v54, %v1668_v62 }
 0x6fc   :  { %v1087_v6 = vpop.permute.xlu1 %1086  ;;  %1267 = vmatprep.subr.mxu1 %v1125_v51 }
 0x6fd   :  { %1196 = vmatprep.subr.mxu0 %v1123_v21  ;;  %v1085_v45 = vpop.permute.xlu0 %1084  ;;  %1268 = vmatpush1.msra.mxu1 %v1124_v61 }
 0x6fe   :  { %1197 = vmatpush1.msra.mxu0 %v1122_v23  ;;  %v1092_v43 = vsel %vm256_vm3, %v1085_v45, %v1087_v6 }
 0x6ff   :  { %v1101_v32 = vmul.f32 %v1092_v43, %v1662_v58 }
 0x700   :  { %v1091_v36 = vpop.permute.xlu1 %1090 }
 0x701   :  { %v1100_v63 = vsel %vm256_vm3, %v1091_v36, %v1085_v45  ;;  %v1089_v60 = vpop.permute.xlu0 %1088 }
 0x702   :  { %v1104_v16 = vmul.f32 %v1100_v63, %v1700_v26  ;;  %v1093_v31 = vsel %vm256_vm3, %v1087_v6, %v1089_v60  ;;  %v1094_v62 = vsel %vm256_vm3, %v1089_v60, %v1091_v36  ;;  %v1081_v26 = vmul.f32 %v1981_v34, %v1655_v55 }
 0x703   :  { %v1102_v37 = vmul.f32 %v1093_v31, %v1645_v49  ;;  %v1103_v30 = vmul.f32 %v1094_v62, %v1695_v24  ;;  %v1080_v49 = vmul.f32 %v1979_v2, %v1665_v59 }
 0x704   :  { %v1063_v38 = vpop.permute.xlu1 %1062  ;;  %1269 = vmatprep.subr.mxu1 %v1104_v16 }
 0x705   :  { %1198 = vmatprep.subr.mxu0 %v1102_v37  ;;  %v1060_v10 = vpop.permute.xlu0 %1059  ;;  %1270 = vmatpush1.msra.mxu1 %v1103_v30 }
 0x706   :  { %1199 = vmatpush1.msra.mxu0 %v1101_v32  ;;  %1271 = vmatprep.subr.mxu1 %v1083_v28  ;;  %v1075_v24 = vsel %vm189_vm4, %v1060_v10, %v1063_v38  ;;  %v1403_v32 = vld [vmem:[%s2181_s1 + $0x10] sm:$0xff] }
 0x707   :  { %1200 = vmatprep.subr.mxu0 %v1081_v26  ;;  %1272 = vmatpush1.msra.mxu1 %v1082_v12  ;;  %v1076_v59 = vmul.f32 %v1075_v24, %v1713_v40 }
 0x708   :  { %1201 = vmatpush1.msra.mxu0 %v1080_v49  ;;  %v1067_v58 = vpop.permute.xlu1 %1066 }
 0x709   :  { %v1070_v27 = vsel %vm189_vm4, %v1067_v58, %v1060_v10  ;;  %v1065_v39 = vpop.permute.xlu0 %1064 }
 0x70a   :  { %v1079_v14 = vmul.f32 %v1070_v27, %v1751_v18  ;;  %v1068_v55 = vsel %vm189_vm4, %v1063_v38, %v1065_v39  ;;  %v1069_v29 = vsel %vm189_vm4, %v1065_v39, %v1067_v58 }
 0x70b   :  { %v1077_v57 = vmul.f32 %v1068_v55, %v1690_v22  ;;  %v1078_v25 = vmul.f32 %v1069_v29, %v1747_v17 }
 0x70c   :  { %v1042_v0 = vpop.permute.xlu1 %1041  ;;  %1273 = vmatprep.subr.mxu1 %v1079_v14 }
 0x70d   :  { %v1039_v13 = vpop.permute.xlu0 %1038  ;;  %1202 = vmatprep.subr.mxu0 %v1077_v57  ;;  %1274 = vmatpush1.msra.mxu1 %v1078_v25 }
 0x70e   :  { %1203 = vmatpush1.msra.mxu0 %v1076_v59  ;;  %v1054_v44 = vsel %vm146_vm5, %v1039_v13, %v1042_v0 }
 0x70f   :  { %v1055_v20 = vmul.f32 %v1054_v44, %v1731_v3 }
 0x710   :  { %v1046_v1 = vpop.permute.xlu1 %1045 }
 0x711   :  { %v1049_v18 = vsel %vm146_vm5, %v1046_v1, %v1039_v13  ;;  %v1044_v56 = vpop.permute.xlu0 %1043 }
 0x712   :  { %v1058_v50 = vmul.f32 %v1049_v18, %v1774_v47  ;;  %v1047_v22 = vsel %vm146_vm5, %v1042_v0, %v1044_v56  ;;  %v1048_v17 = vsel %vm146_vm5, %v1044_v56, %v1046_v1 }
 0x713   :  { %v1056_v40 = vmul.f32 %v1047_v22, %v1728_v52  ;;  %v1057_v51 = vmul.f32 %v1048_v17, %v1771_v46 }
 0x714   :  { %v1021_v54 = vpop.permute.xlu1 %1020  ;;  %1275 = vmatprep.subr.mxu1 %v1058_v50 }
 0x715   :  { %v1018_v21 = vpop.permute.xlu0 %1017  ;;  %1204 = vmatprep.subr.mxu0 %v1056_v40  ;;  %1276 = vmatpush1.msra.mxu1 %v1057_v51 }
 0x716   :  { %1205 = vmatpush1.msra.mxu0 %v1055_v20  ;;  %v1033_v23 = vsel %vm103_vm6, %v1018_v21, %v1021_v54 }
 0x717   :  { %v1034_v43 = vmul.f32 %v1033_v23, %v1754_v19 }
 0x718   :  { %v1025_v61 = vpop.permute.xlu1 %1024 }
 0x719   :  { %v1028_v47 = vsel %vm103_vm6, %v1025_v61, %v1018_v21  ;;  %v1023_v6 = vpop.permute.xlu0 %1022 }
 0x71a   :  { %v1037_v45 = vmul.f32 %v1028_v47, %v1789_v8  ;;  %v1026_v52 = vsel %vm103_vm6, %v1021_v54, %v1023_v6  ;;  %v1027_v46 = vsel %vm103_vm6, %v1023_v6, %v1025_v61 }
 0x71b   :  { %v1035_v3 = vmul.f32 %v1026_v52, %v1741_v9  ;;  %v1036_v36 = vmul.f32 %v1027_v46, %v1783_v5 }
 0x71c   :  { %v1000_v63 = vpop.permute.xlu1 %999  ;;  %1277 = vmatprep.subr.mxu1 %v1037_v45 }
 0x71d   :  { %v994_v60 = vpop.permute.xlu0 %993  ;;  %1206 = vmatprep.subr.mxu0 %v1035_v3  ;;  %1278 = vmatpush1.msra.mxu1 %v1036_v36 }
 0x71e   :  { %1207 = vmatpush1.msra.mxu0 %v1034_v43  ;;  %v1012_v31 = vsel %vm60_vm7, %v994_v60, %v1000_v63 }
 0x71f   :  { %v1013_v38 = vmul.f32 %v1012_v31, %v1777_v48 }
 0x720   :  { %v1004_v16 = vpop.permute.xlu1 %1003 }
 0x721   :  { %v1007_v8 = vsel %vm60_vm7, %v1004_v16, %v994_v60  ;;  %v1002_v62 = vpop.permute.xlu0 %1001 }
 0x722   :  { %v1016_v37 = vmul.f32 %v1007_v8, %v1795_v15  ;;  %v1005_v9 = vsel %vm60_vm7, %v1000_v63, %v1002_v62  ;;  %v1006_v5 = vsel %vm60_vm7, %v1002_v62, %v1004_v16 }
 0x723   :  { %v1014_v19 = vmul.f32 %v1005_v9, %v1766_v41  ;;  %v1015_v30 = vmul.f32 %v1006_v5, %v1800_v33 }
 0x724   :  { %1279 = vmatprep.subr.mxu1 %v1016_v37 }
 0x725   :  { %1208 = vmatprep.subr.mxu0 %v1014_v19  ;;  %1280 = vmatpush1.msra.mxu1 %v1015_v30 }
 0x726   :  { %1209 = vmatpush1.msra.mxu0 %v1013_v38  ;;  %1405 = vmatmul.mubr.msk.f32.vlgmr.msra.gmra.mxu1 %vm421_vm8, %v1403_v32 }
 0x727   :  { %1404 = vmatmul.mubr.msk.f32.vlgmr.msra.gmra.mxu0 %vm421_vm8, %v1403_v32 }
 0x72e   :  { %v1173_v15 = vpop.permute.xlu0 %1172 }
 0x7e6   :  { %v1315_v28 = vpop.f32.mrf.mxu1 }
 0x7e7   :  { %v1244_v10 = vpop.f32.mrf.mxu0  ;;  %v1316_v41 = vadd.f32 %v1315_v28, %v1173_v15 }
 0x7e8   :  { %v1245_v26 = vadd.f32 %v1244_v10, %v1173_v15  ;;  %v1317_v33 = vpop.f32.mrf.mxu1 }
 0x7e9   :  { %v1408_v12 = vmul.f32 -1.442695, %v1316_v41  ;;  %v1246_v49 = vpop.f32.mrf.mxu0  ;;  %v1318_v58 = vadd.f32 %v1317_v33, %v1173_v15 }
 0x7ea   :  { %v1406_v24 = vmul.f32 -1.442695, %v1245_v26  ;;  %v1247_v27 = vadd.f32 %v1246_v49, %v1173_v15 }
 0x7eb   :  { %1428 = vpow2.f32 %v1408_v12  ;;  %v1409_v48 = vmul.f32 -1.442695, %v1318_v58 }
 0x7ec   :  { %1430 = vpow2.f32 %v1406_v24  ;;  %v1407_v39 = vmul.f32 -1.442695, %v1247_v27 }
 0x7ed   :  { %1432 = vpow2.f32 %v1409_v48 }
 0x7ee   :  { %1434 = vpow2.f32 %v1407_v39 }
 0x7f8   :  { %v1429_v14 = vpop.eup %1428 }
 0x7f9   :  { %v1431_v55 = vpop.eup %1430  ;;  %v1334_v29 = vadd.f32 1.0, %v1429_v14 }
 0x7fa   :  { %v1433_v57 = vpop.eup %1432  ;;  %v1332_v25 = vadd.f32 1.0, %v1431_v55 }
 0x7fb   :  { %v1435_v59 = vpop.eup %1434  ;;  %1436 = vrcp.f32 %v1334_v29  ;;  %v1335_v0 = vadd.f32 1.0, %v1433_v57 }
 0x7fc   :  { %1438 = vrcp.f32 %v1332_v25  ;;  %v1333_v13 = vadd.f32 1.0, %v1435_v59 }
 0x7fd   :  { %1440 = vrcp.f32 %v1335_v0 }
 0x7fe   :  { %1442 = vrcp.f32 %v1333_v13 }
 0x808   :  { %v1437_v1 = vpop.eup %1436 }
 0x809   :  { %v1439_v44 = vpop.eup %1438  ;;  %v1346_v18 = vmul.f32 %v1437_v1, %v1983_v4 }
 0x80a   :  { %v1441_v56 = vpop.eup %1440  ;;  %v1344_v50 = vmul.f32 %v1439_v44, %v1979_v2 }
 0x80b   :  { %v1443_v22 = vpop.eup %1442  ;;  %v1347_v17 = vmul.f32 %v1441_v56, %v1985_v7  ;;  %v1350_v51 = vadd.f32 %v2004_v53, %v1346_v18 }
 0x80c   :  { %v1345_v40 = vmul.f32 %v1443_v22, %v1981_v34  ;;  %v1348_v54 = vadd.f32 %v1990_v35, %v1344_v50 }
 0x80d   :  { %v1351_v20 = vadd.f32 %v2011_v11, %v1347_v17 }
 0x80e   :  { %v1349_v21 = vadd.f32 %v1997_v42, %v1345_v40 }
 0x80f   :  { %v1368_v61 = vcombine.low %v1350_v51, %v1351_v20 }
 0x810   :  { %v1358_v23 = vcombine.low %v1348_v54, %v1349_v21 }
 0x811   :  { %1410 = vst [vmem:[%s2186_s6 + $0x8] sm:$0xff] %v1368_v61 }
 0x812   :  { %1360 = vst [vmem:[%s2186_s6] sm:$0xff] %v1358_v23 }

</bundles_post_ra>
